<compile_context>
chip_gen: v5e
topology: v5e:2x2
jax: 0.10.0
libtpu: 0.0.40
codegen_flags: <defaults>
</compile_context>

<pallas_src>
import numpy as np
import jax
import jax.numpy as jnp
from jax import lax
from jax.experimental import pallas as pl
from jax.experimental.pallas import tpu as pltpu

# ---------------- model dims (small, TPU-friendly) ----------------
B, T, H, V = 8, 8, 128, 256      # batch, seq_len, hidden_size, input_size (vocab)


def encoder_rnn_kernel(x_ref, wih_ref, whh_ref, b_ref, out_ref, hn_ref, cn_ref):
    """x_ref: (T, B, H) embedded input (time-major). Gate order: i, f, g, o."""
    # ---- hoisted input projection: one big matmul covers every timestep ----
    x_all = x_ref[...].reshape(T * B, H)                       # (T*B, H)
    xg_all = (jnp.dot(x_all, wih_ref[...], preferred_element_type=jnp.float32)
              + b_ref[...])                                    # (T*B, 4H)

    whh = whh_ref[...]                                         # (H, 4H)
    h = jnp.zeros((B, H), jnp.float32)
    c = jnp.zeros((B, H), jnp.float32)

    # T is a small compile-time constant: fully unroll so the scheduler can
    # overlap each step's h @ W_hh MXU push with the previous step's gate math.
    for t in range(T):
        gates = xg_all[t * B:(t + 1) * B, :] + jnp.dot(
            h, whh, preferred_element_type=jnp.float32)        # (B, 4H)
        i = jax.nn.sigmoid(gates[:, 0 * H:1 * H])
        f = jax.nn.sigmoid(gates[:, 1 * H:2 * H])
        g = jnp.tanh(gates[:, 2 * H:3 * H])
        o = jax.nn.sigmoid(gates[:, 3 * H:4 * H])
        c = f * c + i * g
        h = o * jnp.tanh(c)
        out_ref[t] = h                                         # lane-dense (B, H) store

    hn_ref[...] = h
    cn_ref[...] = c


def encoder_rnn_forward(input_ids, params):
    """input_ids: (B, T) int32 token ids.
    Returns (output (B,T,H), (h_n (1,B,H), c_n (1,B,H))) — matching nn.LSTM."""
    # Embedding gather directly in time-major order (glue; plain JAX).
    emb_tbh = params["embedding"][input_ids.T].astype(jnp.float32)   # (T, B, H)
    # TODO(synk): nn.Dropout(p=0.1) is applied in eval mode (identity);
    # training-mode dropout randomness is not reproduced.

    vmem = pl.BlockSpec(memory_space=pltpu.MemorySpace.VMEM)
    out_tbh, h_n, c_n = pl.pallas_call(
        encoder_rnn_kernel,
        out_shape=(jax.ShapeDtypeStruct((T, B, H), jnp.float32),
                   jax.ShapeDtypeStruct((B, H), jnp.float32),
                   jax.ShapeDtypeStruct((B, H), jnp.float32)),
        in_specs=[vmem, vmem, vmem, vmem],
        out_specs=(vmem, vmem, vmem),
    )(emb_tbh, params["wih_t"], params["whh_t"], params["b"])

    output = jnp.transpose(out_tbh, (1, 0, 2))                 # (B, T, H)
    return output, (h_n[None, :, :], c_n[None, :, :])


# ---------------- deterministic parameter init ----------------
def init_params(key):
    ks = jax.random.split(key, 4)
    u = lambda k, shape, scale: jax.random.uniform(k, shape, jnp.float32, -scale, scale)
    s = 1.0 / float(np.sqrt(H))
    return dict(
        embedding=u(ks[0], (V, H), 0.1),
        wih_t=u(ks[1], (H, 4 * H), s),     # weight_ih_l0.T
        whh_t=u(ks[2], (H, 4 * H), s),     # weight_hh_l0.T
        b=u(ks[3], (1, 4 * H), s),         # bias_ih + bias_hh (combined)
    )


# ---------------- pure-JAX reference (for correctness check) ----------------
def reference_forward(input_ids, params):
    x = params["embedding"][input_ids.T].astype(jnp.float32)   # (T, B, H)
    wih_t, whh_t, b = params["wih_t"], params["whh_t"], params["b"]

    def step(carry, x_t):
        h, c = carry
        gates = x_t @ wih_t + h @ whh_t + b
        i = jax.nn.sigmoid(gates[:, 0 * H:1 * H])
        f = jax.nn.sigmoid(gates[:, 1 * H:2 * H])
        g = jnp.tanh(gates[:, 2 * H:3 * H])
        o = jax.nn.sigmoid(gates[:, 3 * H:4 * H])
        c = f * c + i * g
        h = o * jnp.tanh(c)
        return (h, c), h

    zeros = jnp.zeros((B, H), jnp.float32)
    (h_n, c_n), hs = lax.scan(step, (zeros, zeros), x)
    return jnp.transpose(hs, (1, 0, 2)), (h_n[None], c_n[None])


if __name__ == "__main__":
    key = jax.random.PRNGKey(0)
    pkey, ikey = jax.random.split(key)

    params = init_params(pkey)
    input_ids = jax.random.randint(ikey, (B, T), 0, V, dtype=jnp.int32)   # token ids

    fwd = jax.jit(encoder_rnn_forward)
    output, (h_n, c_n) = fwd(input_ids, params)
    jax.block_until_ready((output, h_n, c_n))

    ref_out, (ref_h, ref_c) = reference_forward(input_ids, params)
    assert output.shape == (B, T, H)
    assert h_n.shape == (1, B, H) and c_n.shape == (1, B, H)
    assert np.allclose(np.asarray(output), np.asarray(ref_out), atol=2e-2, rtol=2e-2)
    assert np.allclose(np.asarray(h_n), np.asarray(ref_h), atol=2e-2, rtol=2e-2)
    assert np.allclose(np.asarray(c_n), np.asarray(ref_c), atol=2e-2, rtol=2e-2)

    print("KERNEL_OK")
</pallas_src>

<mosaic_0001>
module attributes {stable_mosaic.version = 11 : i64} {
  func.func @encoder_rnn_kernel(%arg0: memref<8x8x128xf32, #tpu.memory_space<vmem>>, %arg1: memref<128x512xf32, #tpu.memory_space<vmem>>, %arg2: memref<128x512xf32, #tpu.memory_space<vmem>>, %arg3: memref<1x512xf32, #tpu.memory_space<vmem>>, %arg4: memref<8x8x128xf32, #tpu.memory_space<vmem>>, %arg5: memref<8x128xf32, #tpu.memory_space<vmem>>, %arg6: memref<8x128xf32, #tpu.memory_space<vmem>>) attributes {dimension_semantics = [], scalar_prefetch = 0 : i64, scratch_operands = 0 : i64, tpu.core_type = #tpu.core_type<tc>} {
    %c0 = arith.constant 0 : index
    %c0_0 = arith.constant 0 : index
    %c0_1 = arith.constant 0 : index
    %0 = vector.load %arg0[%c0, %c0_0, %c0_1] : memref<8x8x128xf32, #tpu.memory_space<vmem>>, vector<8x8x128xf32>
    %1 = vector.shape_cast %0 : vector<8x8x128xf32> to vector<64x128xf32>
    %c0_2 = arith.constant 0 : index
    %c0_3 = arith.constant 0 : index
    %2 = vector.load %arg1[%c0_2, %c0_3] : memref<128x512xf32, #tpu.memory_space<vmem>>, vector<128x512xf32>
    %cst = arith.constant dense<0.000000e+00> : vector<64x512xf32>
    %3 = tpu.matmul %1, %2, %cst {dimension_numbers = #tpu.dot_dimension_numbers<[1], [0], [0], [1], [0, 0, 1, 1], [], []>} : vector<64x128xf32>, vector<128x512xf32>, vector<64x512xf32> -> vector<64x512xf32>
    %c0_4 = arith.constant 0 : index
    %c0_5 = arith.constant 0 : index
    %4 = vector.load %arg3[%c0_4, %c0_5] : memref<1x512xf32, #tpu.memory_space<vmem>>, vector<1x512xf32>
    %5 = vector.broadcast %4 : vector<1x512xf32> to vector<64x512xf32>
    %6 = arith.addf %3, %5 : vector<64x512xf32>
    %c0_6 = arith.constant 0 : index
    %c0_7 = arith.constant 0 : index
    %7 = vector.load %arg2[%c0_6, %c0_7] : memref<128x512xf32, #tpu.memory_space<vmem>>, vector<128x512xf32>
    %cst_8 = arith.constant 0.000000e+00 : f32
    %8 = vector.broadcast %cst_8 : f32 to vector<8x128xf32>
    %cst_9 = arith.constant 0.000000e+00 : f32
    %9 = vector.broadcast %cst_9 : f32 to vector<8x128xf32>
    %10 = vector.extract_strided_slice %6 {offsets = [0, 0], sizes = [8, 512], strides = [1, 1]} : vector<64x512xf32> to vector<8x512xf32>
    %cst_10 = arith.constant dense<0.000000e+00> : vector<8x512xf32>
    %11 = tpu.matmul %8, %7, %cst_10 {dimension_numbers = #tpu.dot_dimension_numbers<[1], [0], [0], [1], [0, 0, 1, 1], [], []>} : vector<8x128xf32>, vector<128x512xf32>, vector<8x512xf32> -> vector<8x512xf32>
    %12 = arith.addf %10, %11 : vector<8x512xf32>
    %13 = vector.extract_strided_slice %12 {offsets = [0, 0], sizes = [8, 128], strides = [1, 1]} : vector<8x512xf32> to vector<8x128xf32>
    %14 = arith.negf %13 : vector<8x128xf32>
    %15 = math.exp %14 : vector<8x128xf32>
    %cst_11 = arith.constant 1.000000e+00 : f32
    %16 = vector.broadcast %cst_11 : f32 to vector<8x128xf32>
    %17 = arith.addf %16, %15 : vector<8x128xf32>
    %18 = arith.divf %16, %17 : vector<8x128xf32>
    %19 = vector.extract_strided_slice %12 {offsets = [0, 128], sizes = [8, 128], strides = [1, 1]} : vector<8x512xf32> to vector<8x128xf32>
    %20 = arith.negf %19 : vector<8x128xf32>
    %21 = math.exp %20 : vector<8x128xf32>
    %cst_12 = arith.constant 1.000000e+00 : f32
    %22 = vector.broadcast %cst_12 : f32 to vector<8x128xf32>
    %23 = arith.addf %22, %21 : vector<8x128xf32>
    %24 = arith.divf %22, %23 : vector<8x128xf32>
    %25 = vector.extract_strided_slice %12 {offsets = [0, 256], sizes = [8, 128], strides = [1, 1]} : vector<8x512xf32> to vector<8x128xf32>
    %26 = math.tanh %25 : vector<8x128xf32>
    %27 = vector.extract_strided_slice %12 {offsets = [0, 384], sizes = [8, 128], strides = [1, 1]} : vector<8x512xf32> to vector<8x128xf32>
    %28 = arith.negf %27 : vector<8x128xf32>
    %29 = math.exp %28 : vector<8x128xf32>
    %cst_13 = arith.constant 1.000000e+00 : f32
    %30 = vector.broadcast %cst_13 : f32 to vector<8x128xf32>
    %31 = arith.addf %30, %29 : vector<8x128xf32>
    %32 = arith.divf %30, %31 : vector<8x128xf32>
    %33 = arith.mulf %24, %9 : vector<8x128xf32>
    %34 = arith.mulf %18, %26 : vector<8x128xf32>
    %35 = arith.addf %33, %34 : vector<8x128xf32>
    %36 = math.tanh %35 : vector<8x128xf32>
    %37 = arith.mulf %32, %36 : vector<8x128xf32>
    %c0_14 = arith.constant 0 : index
    %c0_15 = arith.constant 0 : index
    %c0_16 = arith.constant 0 : index
    %38 = vector.load %arg4[%c0_14, %c0_15, %c0_16] : memref<8x8x128xf32, #tpu.memory_space<vmem>>, vector<1x8x128xf32>
    %39 = vector.shape_cast %38 : vector<1x8x128xf32> to vector<8x128xf32>
    %40 = vector.shape_cast %37 : vector<8x128xf32> to vector<1x8x128xf32>
    tpu.vector_store %arg4[%c0_14, %c0_15, %c0_16], %40 {strides = array<i32>} : memref<8x8x128xf32, #tpu.memory_space<vmem>>, vector<1x8x128xf32>,
    %41 = vector.extract_strided_slice %6 {offsets = [8, 0], sizes = [8, 512], strides = [1, 1]} : vector<64x512xf32> to vector<8x512xf32>
    %cst_17 = arith.constant dense<0.000000e+00> : vector<8x512xf32>
    %42 = tpu.matmul %37, %7, %cst_17 {dimension_numbers = #tpu.dot_dimension_numbers<[1], [0], [0], [1], [0, 0, 1, 1], [], []>} : vector<8x128xf32>, vector<128x512xf32>, vector<8x512xf32> -> vector<8x512xf32>
    %43 = arith.addf %41, %42 : vector<8x512xf32>
    %44 = vector.extract_strided_slice %43 {offsets = [0, 0], sizes = [8, 128], strides = [1, 1]} : vector<8x512xf32> to vector<8x128xf32>
    %45 = arith.negf %44 : vector<8x128xf32>
    %46 = math.exp %45 : vector<8x128xf32>
    %cst_18 = arith.constant 1.000000e+00 : f32
    %47 = vector.broadcast %cst_18 : f32 to vector<8x128xf32>
    %48 = arith.addf %47, %46 : vector<8x128xf32>
    %49 = arith.divf %47, %48 : vector<8x128xf32>
    %50 = vector.extract_strided_slice %43 {offsets = [0, 128], sizes = [8, 128], strides = [1, 1]} : vector<8x512xf32> to vector<8x128xf32>
    %51 = arith.negf %50 : vector<8x128xf32>
    %52 = math.exp %51 : vector<8x128xf32>
    %cst_19 = arith.constant 1.000000e+00 : f32
    %53 = vector.broadcast %cst_19 : f32 to vector<8x128xf32>
    %54 = arith.addf %53, %52 : vector<8x128xf32>
    %55 = arith.divf %53, %54 : vector<8x128xf32>
    %56 = vector.extract_strided_slice %43 {offsets = [0, 256], sizes = [8, 128], strides = [1, 1]} : vector<8x512xf32> to vector<8x128xf32>
    %57 = math.tanh %56 : vector<8x128xf32>
    %58 = vector.extract_strided_slice %43 {offsets = [0, 384], sizes = [8, 128], strides = [1, 1]} : vector<8x512xf32> to vector<8x128xf32>
    %59 = arith.negf %58 : vector<8x128xf32>
    %60 = math.exp %59 : vector<8x128xf32>
    %cst_20 = arith.constant 1.000000e+00 : f32
    %61 = vector.broadcast %cst_20 : f32 to vector<8x128xf32>
    %62 = arith.addf %61, %60 : vector<8x128xf32>
    %63 = arith.divf %61, %62 : vector<8x128xf32>
    %64 = arith.mulf %55, %35 : vector<8x128xf32>
    %65 = arith.mulf %49, %57 : vector<8x128xf32>
    %66 = arith.addf %64, %65 : vector<8x128xf32>
    %67 = math.tanh %66 : vector<8x128xf32>
    %68 = arith.mulf %63, %67 : vector<8x128xf32>
    %c1 = arith.constant 1 : index
    %c0_21 = arith.constant 0 : index
    %c0_22 = arith.constant 0 : index
    %69 = vector.load %arg4[%c1, %c0_21, %c0_22] : memref<8x8x128xf32, #tpu.memory_space<vmem>>, vector<1x8x128xf32>
    %70 = vector.shape_cast %69 : vector<1x8x128xf32> to vector<8x128xf32>
    %71 = vector.shape_cast %68 : vector<8x128xf32> to vector<1x8x128xf32>
    tpu.vector_store %arg4[%c1, %c0_21, %c0_22], %71 {strides = array<i32>} : memref<8x8x128xf32, #tpu.memory_space<vmem>>, vector<1x8x128xf32>,
    %72 = vector.extract_strided_slice %6 {offsets = [16, 0], sizes = [8, 512], strides = [1, 1]} : vector<64x512xf32> to vector<8x512xf32>
    %cst_23 = arith.constant dense<0.000000e+00> : vector<8x512xf32>
    %73 = tpu.matmul %68, %7, %cst_23 {dimension_numbers = #tpu.dot_dimension_numbers<[1], [0], [0], [1], [0, 0, 1, 1], [], []>} : vector<8x128xf32>, vector<128x512xf32>, vector<8x512xf32> -> vector<8x512xf32>
    %74 = arith.addf %72, %73 : vector<8x512xf32>
    %75 = vector.extract_strided_slice %74 {offsets = [0, 0], sizes = [8, 128], strides = [1, 1]} : vector<8x512xf32> to vector<8x128xf32>
    %76 = arith.negf %75 : vector<8x128xf32>
    %77 = math.exp %76 : vector<8x128xf32>
    %cst_24 = arith.constant 1.000000e+00 : f32
    %78 = vector.broadcast %cst_24 : f32 to vector<8x128xf32>
    %79 = arith.addf %78, %77 : vector<8x128xf32>
    %80 = arith.divf %78, %79 : vector<8x128xf32>
    %81 = vector.extract_strided_slice %74 {offsets = [0, 128], sizes = [8, 128], strides = [1, 1]} : vector<8x512xf32> to vector<8x128xf32>
    %82 = arith.negf %81 : vector<8x128xf32>
    %83 = math.exp %82 : vector<8x128xf32>
    %cst_25 = arith.constant 1.000000e+00 : f32
    %84 = vector.broadcast %cst_25 : f32 to vector<8x128xf32>
    %85 = arith.addf %84, %83 : vector<8x128xf32>
    %86 = arith.divf %84, %85 : vector<8x128xf32>
    %87 = vector.extract_strided_slice %74 {offsets = [0, 256], sizes = [8, 128], strides = [1, 1]} : vector<8x512xf32> to vector<8x128xf32>
    %88 = math.tanh %87 : vector<8x128xf32>
    %89 = vector.extract_strided_slice %74 {offsets = [0, 384], sizes = [8, 128], strides = [1, 1]} : vector<8x512xf32> to vector<8x128xf32>
    %90 = arith.negf %89 : vector<8x128xf32>
    %91 = math.exp %90 : vector<8x128xf32>
    %cst_26 = arith.constant 1.000000e+00 : f32
    %92 = vector.broadcast %cst_26 : f32 to vector<8x128xf32>
    %93 = arith.addf %92, %91 : vector<8x128xf32>
    %94 = arith.divf %92, %93 : vector<8x128xf32>
    %95 = arith.mulf %86, %66 : vector<8x128xf32>
    %96 = arith.mulf %80, %88 : vector<8x128xf32>
    %97 = arith.addf %95, %96 : vector<8x128xf32>
    %98 = math.tanh %97 : vector<8x128xf32>
    %99 = arith.mulf %94, %98 : vector<8x128xf32>
    %c2 = arith.constant 2 : index
    %c0_27 = arith.constant 0 : index
    %c0_28 = arith.constant 0 : index
    %100 = vector.load %arg4[%c2, %c0_27, %c0_28] : memref<8x8x128xf32, #tpu.memory_space<vmem>>, vector<1x8x128xf32>
    %101 = vector.shape_cast %100 : vector<1x8x128xf32> to vector<8x128xf32>
    %102 = vector.shape_cast %99 : vector<8x128xf32> to vector<1x8x128xf32>
    tpu.vector_store %arg4[%c2, %c0_27, %c0_28], %102 {strides = array<i32>} : memref<8x8x128xf32, #tpu.memory_space<vmem>>, vector<1x8x128xf32>,
    %103 = vector.extract_strided_slice %6 {offsets = [24, 0], sizes = [8, 512], strides = [1, 1]} : vector<64x512xf32> to vector<8x512xf32>
    %cst_29 = arith.constant dense<0.000000e+00> : vector<8x512xf32>
    %104 = tpu.matmul %99, %7, %cst_29 {dimension_numbers = #tpu.dot_dimension_numbers<[1], [0], [0], [1], [0, 0, 1, 1], [], []>} : vector<8x128xf32>, vector<128x512xf32>, vector<8x512xf32> -> vector<8x512xf32>
    %105 = arith.addf %103, %104 : vector<8x512xf32>
    %106 = vector.extract_strided_slice %105 {offsets = [0, 0], sizes = [8, 128], strides = [1, 1]} : vector<8x512xf32> to vector<8x128xf32>
    %107 = arith.negf %106 : vector<8x128xf32>
    %108 = math.exp %107 : vector<8x128xf32>
    %cst_30 = arith.constant 1.000000e+00 : f32
    %109 = vector.broadcast %cst_30 : f32 to vector<8x128xf32>
    %110 = arith.addf %109, %108 : vector<8x128xf32>
    %111 = arith.divf %109, %110 : vector<8x128xf32>
    %112 = vector.extract_strided_slice %105 {offsets = [0, 128], sizes = [8, 128], strides = [1, 1]} : vector<8x512xf32> to vector<8x128xf32>
    %113 = arith.negf %112 : vector<8x128xf32>
    %114 = math.exp %113 : vector<8x128xf32>
    %cst_31 = arith.constant 1.000000e+00 : f32
    %115 = vector.broadcast %cst_31 : f32 to vector<8x128xf32>
    %116 = arith.addf %115, %114 : vector<8x128xf32>
    %117 = arith.divf %115, %116 : vector<8x128xf32>
    %118 = vector.extract_strided_slice %105 {offsets = [0, 256], sizes = [8, 128], strides = [1, 1]} : vector<8x512xf32> to vector<8x128xf32>
    %119 = math.tanh %118 : vector<8x128xf32>
    %120 = vector.extract_strided_slice %105 {offsets = [0, 384], sizes = [8, 128], strides = [1, 1]} : vector<8x512xf32> to vector<8x128xf32>
    %121 = arith.negf %120 : vector<8x128xf32>
    %122 = math.exp %121 : vector<8x128xf32>
    %cst_32 = arith.constant 1.000000e+00 : f32
    %123 = vector.broadcast %cst_32 : f32 to vector<8x128xf32>
    %124 = arith.addf %123, %122 : vector<8x128xf32>
    %125 = arith.divf %123, %124 : vector<8x128xf32>
    %126 = arith.mulf %117, %97 : vector<8x128xf32>
    %127 = arith.mulf %111, %119 : vector<8x128xf32>
    %128 = arith.addf %126, %127 : vector<8x128xf32>
    %129 = math.tanh %128 : vector<8x128xf32>
    %130 = arith.mulf %125, %129 : vector<8x128xf32>
    %c3 = arith.constant 3 : index
    %c0_33 = arith.constant 0 : index
    %c0_34 = arith.constant 0 : index
    %131 = vector.load %arg4[%c3, %c0_33, %c0_34] : memref<8x8x128xf32, #tpu.memory_space<vmem>>, vector<1x8x128xf32>
    %132 = vector.shape_cast %131 : vector<1x8x128xf32> to vector<8x128xf32>
    %133 = vector.shape_cast %130 : vector<8x128xf32> to vector<1x8x128xf32>
    tpu.vector_store %arg4[%c3, %c0_33, %c0_34], %133 {strides = array<i32>} : memref<8x8x128xf32, #tpu.memory_space<vmem>>, vector<1x8x128xf32>,
    %134 = vector.extract_strided_slice %6 {offsets = [32, 0], sizes = [8, 512], strides = [1, 1]} : vector<64x512xf32> to vector<8x512xf32>
    %cst_35 = arith.constant dense<0.000000e+00> : vector<8x512xf32>
    %135 = tpu.matmul %130, %7, %cst_35 {dimension_numbers = #tpu.dot_dimension_numbers<[1], [0], [0], [1], [0, 0, 1, 1], [], []>} : vector<8x128xf32>, vector<128x512xf32>, vector<8x512xf32> -> vector<8x512xf32>
    %136 = arith.addf %134, %135 : vector<8x512xf32>
    %137 = vector.extract_strided_slice %136 {offsets = [0, 0], sizes = [8, 128], strides = [1, 1]} : vector<8x512xf32> to vector<8x128xf32>
    %138 = arith.negf %137 : vector<8x128xf32>
    %139 = math.exp %138 : vector<8x128xf32>
    %cst_36 = arith.constant 1.000000e+00 : f32
    %140 = vector.broadcast %cst_36 : f32 to vector<8x128xf32>
    %141 = arith.addf %140, %139 : vector<8x128xf32>
    %142 = arith.divf %140, %141 : vector<8x128xf32>
    %143 = vector.extract_strided_slice %136 {offsets = [0, 128], sizes = [8, 128], strides = [1, 1]} : vector<8x512xf32> to vector<8x128xf32>
    %144 = arith.negf %143 : vector<8x128xf32>
    %145 = math.exp %144 : vector<8x128xf32>
    %cst_37 = arith.constant 1.000000e+00 : f32
    %146 = vector.broadcast %cst_37 : f32 to vector<8x128xf32>
    %147 = arith.addf %146, %145 : vector<8x128xf32>
    %148 = arith.divf %146, %147 : vector<8x128xf32>
    %149 = vector.extract_strided_slice %136 {offsets = [0, 256], sizes = [8, 128], strides = [1, 1]} : vector<8x512xf32> to vector<8x128xf32>
    %150 = math.tanh %149 : vector<8x128xf32>
    %151 = vector.extract_strided_slice %136 {offsets = [0, 384], sizes = [8, 128], strides = [1, 1]} : vector<8x512xf32> to vector<8x128xf32>
    %152 = arith.negf %151 : vector<8x128xf32>
    %153 = math.exp %152 : vector<8x128xf32>
    %cst_38 = arith.constant 1.000000e+00 : f32
    %154 = vector.broadcast %cst_38 : f32 to vector<8x128xf32>
    %155 = arith.addf %154, %153 : vector<8x128xf32>
    %156 = arith.divf %154, %155 : vector<8x128xf32>
    %157 = arith.mulf %148, %128 : vector<8x128xf32>
    %158 = arith.mulf %142, %150 : vector<8x128xf32>
    %159 = arith.addf %157, %158 : vector<8x128xf32>
    %160 = math.tanh %159 : vector<8x128xf32>
    %161 = arith.mulf %156, %160 : vector<8x128xf32>
    %c4 = arith.constant 4 : index
    %c0_39 = arith.constant 0 : index
    %c0_40 = arith.constant 0 : index
    %162 = vector.load %arg4[%c4, %c0_39, %c0_40] : memref<8x8x128xf32, #tpu.memory_space<vmem>>, vector<1x8x128xf32>
    %163 = vector.shape_cast %162 : vector<1x8x128xf32> to vector<8x128xf32>
    %164 = vector.shape_cast %161 : vector<8x128xf32> to vector<1x8x128xf32>
    tpu.vector_store %arg4[%c4, %c0_39, %c0_40], %164 {strides = array<i32>} : memref<8x8x128xf32, #tpu.memory_space<vmem>>, vector<1x8x128xf32>,
    %165 = vector.extract_strided_slice %6 {offsets = [40, 0], sizes = [8, 512], strides = [1, 1]} : vector<64x512xf32> to vector<8x512xf32>
    %cst_41 = arith.constant dense<0.000000e+00> : vector<8x512xf32>
    %166 = tpu.matmul %161, %7, %cst_41 {dimension_numbers = #tpu.dot_dimension_numbers<[1], [0], [0], [1], [0, 0, 1, 1], [], []>} : vector<8x128xf32>, vector<128x512xf32>, vector<8x512xf32> -> vector<8x512xf32>
    %167 = arith.addf %165, %166 : vector<8x512xf32>
    %168 = vector.extract_strided_slice %167 {offsets = [0, 0], sizes = [8, 128], strides = [1, 1]} : vector<8x512xf32> to vector<8x128xf32>
    %169 = arith.negf %168 : vector<8x128xf32>
    %170 = math.exp %169 : vector<8x128xf32>
    %cst_42 = arith.constant 1.000000e+00 : f32
    %171 = vector.broadcast %cst_42 : f32 to vector<8x128xf32>
    %172 = arith.addf %171, %170 : vector<8x128xf32>
    %173 = arith.divf %171, %172 : vector<8x128xf32>
    %174 = vector.extract_strided_slice %167 {offsets = [0, 128], sizes = [8, 128], strides = [1, 1]} : vector<8x512xf32> to vector<8x128xf32>
    %175 = arith.negf %174 : vector<8x128xf32>
    %176 = math.exp %175 : vector<8x128xf32>
    %cst_43 = arith.constant 1.000000e+00 : f32
    %177 = vector.broadcast %cst_43 : f32 to vector<8x128xf32>
    %178 = arith.addf %177, %176 : vector<8x128xf32>
    %179 = arith.divf %177, %178 : vector<8x128xf32>
    %180 = vector.extract_strided_slice %167 {offsets = [0, 256], sizes = [8, 128], strides = [1, 1]} : vector<8x512xf32> to vector<8x128xf32>
    %181 = math.tanh %180 : vector<8x128xf32>
    %182 = vector.extract_strided_slice %167 {offsets = [0, 384], sizes = [8, 128], strides = [1, 1]} : vector<8x512xf32> to vector<8x128xf32>
    %183 = arith.negf %182 : vector<8x128xf32>
    %184 = math.exp %183 : vector<8x128xf32>
    %cst_44 = arith.constant 1.000000e+00 : f32
    %185 = vector.broadcast %cst_44 : f32 to vector<8x128xf32>
    %186 = arith.addf %185, %184 : vector<8x128xf32>
    %187 = arith.divf %185, %186 : vector<8x128xf32>
    %188 = arith.mulf %179, %159 : vector<8x128xf32>
    %189 = arith.mulf %173, %181 : vector<8x128xf32>
    %190 = arith.addf %188, %189 : vector<8x128xf32>
    %191 = math.tanh %190 : vector<8x128xf32>
    %192 = arith.mulf %187, %191 : vector<8x128xf32>
    %c5 = arith.constant 5 : index
    %c0_45 = arith.constant 0 : index
    %c0_46 = arith.constant 0 : index
    %193 = vector.load %arg4[%c5, %c0_45, %c0_46] : memref<8x8x128xf32, #tpu.memory_space<vmem>>, vector<1x8x128xf32>
    %194 = vector.shape_cast %193 : vector<1x8x128xf32> to vector<8x128xf32>
    %195 = vector.shape_cast %192 : vector<8x128xf32> to vector<1x8x128xf32>
    tpu.vector_store %arg4[%c5, %c0_45, %c0_46], %195 {strides = array<i32>} : memref<8x8x128xf32, #tpu.memory_space<vmem>>, vector<1x8x128xf32>,
    %196 = vector.extract_strided_slice %6 {offsets = [48, 0], sizes = [8, 512], strides = [1, 1]} : vector<64x512xf32> to vector<8x512xf32>
    %cst_47 = arith.constant dense<0.000000e+00> : vector<8x512xf32>
    %197 = tpu.matmul %192, %7, %cst_47 {dimension_numbers = #tpu.dot_dimension_numbers<[1], [0], [0], [1], [0, 0, 1, 1], [], []>} : vector<8x128xf32>, vector<128x512xf32>, vector<8x512xf32> -> vector<8x512xf32>
    %198 = arith.addf %196, %197 : vector<8x512xf32>
    %199 = vector.extract_strided_slice %198 {offsets = [0, 0], sizes = [8, 128], strides = [1, 1]} : vector<8x512xf32> to vector<8x128xf32>
    %200 = arith.negf %199 : vector<8x128xf32>
    %201 = math.exp %200 : vector<8x128xf32>
    %cst_48 = arith.constant 1.000000e+00 : f32
    %202 = vector.broadcast %cst_48 : f32 to vector<8x128xf32>
    %203 = arith.addf %202, %201 : vector<8x128xf32>
    %204 = arith.divf %202, %203 : vector<8x128xf32>
    %205 = vector.extract_strided_slice %198 {offsets = [0, 128], sizes = [8, 128], strides = [1, 1]} : vector<8x512xf32> to vector<8x128xf32>
    %206 = arith.negf %205 : vector<8x128xf32>
    %207 = math.exp %206 : vector<8x128xf32>
    %cst_49 = arith.constant 1.000000e+00 : f32
    %208 = vector.broadcast %cst_49 : f32 to vector<8x128xf32>
    %209 = arith.addf %208, %207 : vector<8x128xf32>
    %210 = arith.divf %208, %209 : vector<8x128xf32>
    %211 = vector.extract_strided_slice %198 {offsets = [0, 256], sizes = [8, 128], strides = [1, 1]} : vector<8x512xf32> to vector<8x128xf32>
    %212 = math.tanh %211 : vector<8x128xf32>
    %213 = vector.extract_strided_slice %198 {offsets = [0, 384], sizes = [8, 128], strides = [1, 1]} : vector<8x512xf32> to vector<8x128xf32>
    %214 = arith.negf %213 : vector<8x128xf32>
    %215 = math.exp %214 : vector<8x128xf32>
    %cst_50 = arith.constant 1.000000e+00 : f32
    %216 = vector.broadcast %cst_50 : f32 to vector<8x128xf32>
    %217 = arith.addf %216, %215 : vector<8x128xf32>
    %218 = arith.divf %216, %217 : vector<8x128xf32>
    %219 = arith.mulf %210, %190 : vector<8x128xf32>
    %220 = arith.mulf %204, %212 : vector<8x128xf32>
    %221 = arith.addf %219, %220 : vector<8x128xf32>
    %222 = math.tanh %221 : vector<8x128xf32>
    %223 = arith.mulf %218, %222 : vector<8x128xf32>
    %c6 = arith.constant 6 : index
    %c0_51 = arith.constant 0 : index
    %c0_52 = arith.constant 0 : index
    %224 = vector.load %arg4[%c6, %c0_51, %c0_52] : memref<8x8x128xf32, #tpu.memory_space<vmem>>, vector<1x8x128xf32>
    %225 = vector.shape_cast %224 : vector<1x8x128xf32> to vector<8x128xf32>
    %226 = vector.shape_cast %223 : vector<8x128xf32> to vector<1x8x128xf32>
    tpu.vector_store %arg4[%c6, %c0_51, %c0_52], %226 {strides = array<i32>} : memref<8x8x128xf32, #tpu.memory_space<vmem>>, vector<1x8x128xf32>,
    %227 = vector.extract_strided_slice %6 {offsets = [56, 0], sizes = [8, 512], strides = [1, 1]} : vector<64x512xf32> to vector<8x512xf32>
    %cst_53 = arith.constant dense<0.000000e+00> : vector<8x512xf32>
    %228 = tpu.matmul %223, %7, %cst_53 {dimension_numbers = #tpu.dot_dimension_numbers<[1], [0], [0], [1], [0, 0, 1, 1], [], []>} : vector<8x128xf32>, vector<128x512xf32>, vector<8x512xf32> -> vector<8x512xf32>
    %229 = arith.addf %227, %228 : vector<8x512xf32>
    %230 = vector.extract_strided_slice %229 {offsets = [0, 0], sizes = [8, 128], strides = [1, 1]} : vector<8x512xf32> to vector<8x128xf32>
    %231 = arith.negf %230 : vector<8x128xf32>
    %232 = math.exp %231 : vector<8x128xf32>
    %cst_54 = arith.constant 1.000000e+00 : f32
    %233 = vector.broadcast %cst_54 : f32 to vector<8x128xf32>
    %234 = arith.addf %233, %232 : vector<8x128xf32>
    %235 = arith.divf %233, %234 : vector<8x128xf32>
    %236 = vector.extract_strided_slice %229 {offsets = [0, 128], sizes = [8, 128], strides = [1, 1]} : vector<8x512xf32> to vector<8x128xf32>
    %237 = arith.negf %236 : vector<8x128xf32>
    %238 = math.exp %237 : vector<8x128xf32>
    %cst_55 = arith.constant 1.000000e+00 : f32
    %239 = vector.broadcast %cst_55 : f32 to vector<8x128xf32>
    %240 = arith.addf %239, %238 : vector<8x128xf32>
    %241 = arith.divf %239, %240 : vector<8x128xf32>
    %242 = vector.extract_strided_slice %229 {offsets = [0, 256], sizes = [8, 128], strides = [1, 1]} : vector<8x512xf32> to vector<8x128xf32>
    %243 = math.tanh %242 : vector<8x128xf32>
    %244 = vector.extract_strided_slice %229 {offsets = [0, 384], sizes = [8, 128], strides = [1, 1]} : vector<8x512xf32> to vector<8x128xf32>
    %245 = arith.negf %244 : vector<8x128xf32>
    %246 = math.exp %245 : vector<8x128xf32>
    %cst_56 = arith.constant 1.000000e+00 : f32
    %247 = vector.broadcast %cst_56 : f32 to vector<8x128xf32>
    %248 = arith.addf %247, %246 : vector<8x128xf32>
    %249 = arith.divf %247, %248 : vector<8x128xf32>
    %250 = arith.mulf %241, %221 : vector<8x128xf32>
    %251 = arith.mulf %235, %243 : vector<8x128xf32>
    %252 = arith.addf %250, %251 : vector<8x128xf32>
    %253 = math.tanh %252 : vector<8x128xf32>
    %254 = arith.mulf %249, %253 : vector<8x128xf32>
    %c7 = arith.constant 7 : index
    %c0_57 = arith.constant 0 : index
    %c0_58 = arith.constant 0 : index
    %255 = vector.load %arg4[%c7, %c0_57, %c0_58] : memref<8x8x128xf32, #tpu.memory_space<vmem>>, vector<1x8x128xf32>
    %256 = vector.shape_cast %255 : vector<1x8x128xf32> to vector<8x128xf32>
    %257 = vector.shape_cast %254 : vector<8x128xf32> to vector<1x8x128xf32>
    tpu.vector_store %arg4[%c7, %c0_57, %c0_58], %257 {strides = array<i32>} : memref<8x8x128xf32, #tpu.memory_space<vmem>>, vector<1x8x128xf32>,
    %c0_59 = arith.constant 0 : index
    %c0_60 = arith.constant 0 : index
    %258 = vector.load %arg5[%c0_59, %c0_60] : memref<8x128xf32, #tpu.memory_space<vmem>>, vector<8x128xf32>
    tpu.vector_store %arg5[%c0_59, %c0_60], %254 {strides = array<i32>} : memref<8x128xf32, #tpu.memory_space<vmem>>, vector<8x128xf32>,
    %c0_61 = arith.constant 0 : index
    %c0_62 = arith.constant 0 : index
    %259 = vector.load %arg6[%c0_61, %c0_62] : memref<8x128xf32, #tpu.memory_space<vmem>>, vector<8x128xf32>
    tpu.vector_store %arg6[%c0_61, %c0_62], %252 {strides = array<i32>} : memref<8x128xf32, #tpu.memory_space<vmem>>, vector<8x128xf32>,
    return
  }
}

</mosaic_0001>

<bundles_post_ra>
// kernel: encoder_rnn_forward.1
= control target key start
LH: loop header
LB: loop body
LE: loop exit
PB: predicated region body
PF: predicated region fallthrough
CT: control target
= control target key end

     0   :  { %12 = vsyncpa [#allocation3], 0  ;;  %s3074_s0 = inlined_call_operand.vmem [shape: f32[8,8,128], index: 0, kind: input, shape index: {}]   ;;  %s3075_s1 = inlined_call_operand.vmem [shape: f32[128,512], index: 1, kind: input, shape index: {}]   ;;  %s3076_s2 = inlined_call_operand.hbm [shape: f32[128,512], index: 2, kind: input, shape index: {}]   ;;  %s3077_s3 = inlined_call_operand.vmem [shape: f32[1,512], index: 3, kind: input, shape index: {}]   ;;  %s3078_s4 = inlined_call_operand.vmem [shape: f32[8,8,128], index: 4, kind: output, shape index: {0}]   ;;  %s3079_s5 = inlined_call_operand.hbm [shape: f32[8,128], index: 5, kind: output, shape index: {1}]   ;;  %s3080_s6 = inlined_call_operand.hbm [shape: f32[8,128], index: 6, kind: output, shape index: {2}]  }
   0x1   :  { %13 = vsyncpa [#allocation4], 0 }
   0x2   :  { %14 = vsyncpa [#allocation7], 0  ;;  %s23_s23 = sshll.u32 %s3076_s2, 4  ;;  %s1885_s24 = smov [#allocation2]   ;;  %s24_s23 = int_to_ptr.hbm [resolvable:$true] %s23_s23 }
   0x3   :  { %s25_s25 = sshll.u32 %s1885_s24, 4  ;;  %s1886_s26 = smov 512   ;;  %s26_s25 = int_to_ptr.vmem [resolvable:$true] %s25_s25 }
   0x4   :  { %s1887_s27 = smov 32  }
   0x5   :  { %31 = dma.hbm_to_vmem [thread:$0]  %s24_s23, 8192, %s26_s25, [#allocation3], %s1886_s26, %s1886_s26, %s1887_s27  }
   0x6   :  { %1879 = dma.done.wait [#allocation3], 8192  }
   0x7   :  { %1880 = vsyncadd [#allocation3], 4294959104  ;;  %v106_v0 = vld [vmem:[%s3075_s1 + $0x1e0] sm:$0xff]  ;;  %v107_v1 = vld [vmem:[%s3075_s1 + $0x1e8] sm:$0xff]  ;;  %s1889_s2 = smov [#allocation6]   ;;  %s1561_s13 = sshll.u32 %s3080_s6, 4  ;;  %s1562_s13 = int_to_ptr.hbm [resolvable:$true] %s1561_s13 }
   0x8   :  { %v108_v2 = vld [vmem:[%s3075_s1 + $0x1f0] sm:$0xff]  ;;  %120 = vmatpush.msra.mxu0 %v106_v0  ;;  %161 = vmatpush.msra.mxu1 %v107_v1  ;;  %v109_v3 = vld [vmem:[%s3075_s1 + $0x1f8] sm:$0xff]  ;;  %v102_v4 = vld [vmem:[%s3075_s1 + $0x1c0] sm:$0xff]  ;;  %s1559_s10 = sshll.u32 %s1889_s2, 4  ;;  %s1890_s14 = smov [#allocation5]   ;;  %s1560_s10 = int_to_ptr.vmem [resolvable:$true] %s1559_s10 }
   0x9   :  { %v103_v5 = vld [vmem:[%s3075_s1 + $0x1c8] sm:$0xff]  ;;  %202 = vmatpush.msra.mxu2 %v108_v2  ;;  %243 = vmatpush.msra.mxu3 %v109_v3  ;;  %v104_v6 = vld [vmem:[%s3075_s1 + $0x1d0] sm:$0xff]  ;;  %v105_v7 = vld [vmem:[%s3075_s1 + $0x1d8] sm:$0xff]  ;;  %s1548_s6 = sshll.u32 %s1890_s14, 4  ;;  %s1550_s17 = sshll.u32 %s3079_s5, 4  ;;  %s1549_s6 = int_to_ptr.vmem [resolvable:$true] %s1548_s6  ;;  %s1551_s17 = int_to_ptr.hbm [resolvable:$true] %s1550_s17 }
   0xa   :  { %v98_v8 = vld [vmem:[%s3075_s1 + $0x1a0] sm:$0xff]  ;;  %121 = vmatpush.msra.mxu0 %v102_v4  ;;  %162 = vmatpush.msra.mxu1 %v103_v5  ;;  %v99_v9 = vld [vmem:[%s3075_s1 + $0x1a8] sm:$0xff]  ;;  %v100_v10 = vld [vmem:[%s3075_s1 + $0x1b0] sm:$0xff] }
   0xb   :  { %v101_v11 = vld [vmem:[%s3075_s1 + $0x1b8] sm:$0xff]  ;;  %203 = vmatpush.msra.mxu2 %v104_v6  ;;  %244 = vmatpush.msra.mxu3 %v105_v7  ;;  %v94_v12 = vld [vmem:[%s3075_s1 + $0x180] sm:$0xff]  ;;  %v95_v13 = vld [vmem:[%s3075_s1 + $0x188] sm:$0xff] }
   0xc   :  { %122 = vmatpush.msra.mxu0 %v98_v8  ;;  %163 = vmatpush.msra.mxu1 %v99_v9  ;;  %v96_v14 = vld [vmem:[%s3075_s1 + $0x190] sm:$0xff]  ;;  %v97_v15 = vld [vmem:[%s3075_s1 + $0x198] sm:$0xff]  ;;  %v90_v16 = vld [vmem:[%s3075_s1 + $0x160] sm:$0xff] }
   0xd   :  { %204 = vmatpush.msra.mxu2 %v100_v10  ;;  %245 = vmatpush.msra.mxu3 %v101_v11  ;;  %v91_v17 = vld [vmem:[%s3075_s1 + $0x168] sm:$0xff]  ;;  %v92_v18 = vld [vmem:[%s3075_s1 + $0x170] sm:$0xff]  ;;  %v93_v19 = vld [vmem:[%s3075_s1 + $0x178] sm:$0xff] }
   0xe   :  { %123 = vmatpush.msra.mxu0 %v94_v12  ;;  %164 = vmatpush.msra.mxu1 %v95_v13  ;;  %v86_v20 = vld [vmem:[%s3075_s1 + $0x140] sm:$0xff]  ;;  %v87_v21 = vld [vmem:[%s3075_s1 + $0x148] sm:$0xff]  ;;  %v88_v22 = vld [vmem:[%s3075_s1 + $0x150] sm:$0xff] }
   0xf   :  { %205 = vmatpush.msra.mxu2 %v96_v14  ;;  %246 = vmatpush.msra.mxu3 %v97_v15  ;;  %v89_v23 = vld [vmem:[%s3075_s1 + $0x158] sm:$0xff]  ;;  %v82_v24 = vld [vmem:[%s3075_s1 + $0x120] sm:$0xff]  ;;  %v83_v25 = vld [vmem:[%s3075_s1 + $0x128] sm:$0xff] }
  0x10   :  { %124 = vmatpush.msra.mxu0 %v90_v16  ;;  %165 = vmatpush.msra.mxu1 %v91_v17  ;;  %v84_v26 = vld [vmem:[%s3075_s1 + $0x130] sm:$0xff]  ;;  %v85_v27 = vld [vmem:[%s3075_s1 + $0x138] sm:$0xff]  ;;  %v78_v28 = vld [vmem:[%s3075_s1 + $0x100] sm:$0xff] }
  0x11   :  { %206 = vmatpush.msra.mxu2 %v92_v18  ;;  %247 = vmatpush.msra.mxu3 %v93_v19  ;;  %v79_v29 = vld [vmem:[%s3075_s1 + $0x108] sm:$0xff]  ;;  %v80_v30 = vld [vmem:[%s3075_s1 + $0x110] sm:$0xff]  ;;  %v81_v31 = vld [vmem:[%s3075_s1 + $0x118] sm:$0xff] }
  0x12   :  { %125 = vmatpush.msra.mxu0 %v86_v20  ;;  %166 = vmatpush.msra.mxu1 %v87_v21  ;;  %v74_v32 = vld [vmem:[%s3075_s1 + $0xe0] sm:$0xff]  ;;  %v75_v33 = vld [vmem:[%s3075_s1 + $0xe8] sm:$0xff]  ;;  %v76_v34 = vld [vmem:[%s3075_s1 + $0xf0] sm:$0xff] }
  0x13   :  { %207 = vmatpush.msra.mxu2 %v88_v22  ;;  %248 = vmatpush.msra.mxu3 %v89_v23  ;;  %v77_v35 = vld [vmem:[%s3075_s1 + $0xf8] sm:$0xff]  ;;  %v70_v36 = vld [vmem:[%s3075_s1 + $0xc0] sm:$0xff]  ;;  %v71_v37 = vld [vmem:[%s3075_s1 + $0xc8] sm:$0xff] }
  0x14   :  { %126 = vmatpush.msra.mxu0 %v82_v24  ;;  %167 = vmatpush.msra.mxu1 %v83_v25  ;;  %v72_v38 = vld [vmem:[%s3075_s1 + $0xd0] sm:$0xff]  ;;  %v73_v39 = vld [vmem:[%s3075_s1 + $0xd8] sm:$0xff]  ;;  %v66_v40 = vld [vmem:[%s3075_s1 + $0xa0] sm:$0xff] }
  0x15   :  { %208 = vmatpush.msra.mxu2 %v84_v26  ;;  %249 = vmatpush.msra.mxu3 %v85_v27  ;;  %v67_v41 = vld [vmem:[%s3075_s1 + $0xa8] sm:$0xff]  ;;  %v68_v42 = vld [vmem:[%s3075_s1 + $0xb0] sm:$0xff]  ;;  %v69_v43 = vld [vmem:[%s3075_s1 + $0xb8] sm:$0xff] }
  0x16   :  { %127 = vmatpush.msra.mxu0 %v78_v28  ;;  %168 = vmatpush.msra.mxu1 %v79_v29  ;;  %v62_v44 = vld [vmem:[%s3075_s1 + $0x80] sm:$0xff]  ;;  %v63_v45 = vld [vmem:[%s3075_s1 + $0x88] sm:$0xff]  ;;  %v64_v46 = vld [vmem:[%s3075_s1 + $0x90] sm:$0xff] }
  0x17   :  { %209 = vmatpush.msra.mxu2 %v80_v30  ;;  %250 = vmatpush.msra.mxu3 %v81_v31  ;;  %v65_v47 = vld [vmem:[%s3075_s1 + $0x98] sm:$0xff]  ;;  %v58_v48 = vld [vmem:[%s3075_s1 + $0x60] sm:$0xff]  ;;  %v59_v49 = vld [vmem:[%s3075_s1 + $0x68] sm:$0xff] }
  0x18   :  { %128 = vmatpush.msra.mxu0 %v74_v32  ;;  %169 = vmatpush.msra.mxu1 %v75_v33  ;;  %v60_v50 = vld [vmem:[%s3075_s1 + $0x70] sm:$0xff]  ;;  %v61_v51 = vld [vmem:[%s3075_s1 + $0x78] sm:$0xff]  ;;  %v54_v52 = vld [vmem:[%s3075_s1 + $0x40] sm:$0xff] }
  0x19   :  { %210 = vmatpush.msra.mxu2 %v76_v34  ;;  %251 = vmatpush.msra.mxu3 %v77_v35  ;;  %v55_v53 = vld [vmem:[%s3075_s1 + $0x48] sm:$0xff]  ;;  %v56_v54 = vld [vmem:[%s3075_s1 + $0x50] sm:$0xff]  ;;  %v57_v55 = vld [vmem:[%s3075_s1 + $0x58] sm:$0xff] }
  0x1a   :  { %129 = vmatpush.msra.mxu0 %v70_v36  ;;  %170 = vmatpush.msra.mxu1 %v71_v37  ;;  %v50_v56 = vld [vmem:[%s3075_s1 + $0x20] sm:$0xff]  ;;  %v51_v57 = vld [vmem:[%s3075_s1 + $0x28] sm:$0xff]  ;;  %v52_v58 = vld [vmem:[%s3075_s1 + $0x30] sm:$0xff] }
  0x1b   :  { %211 = vmatpush.msra.mxu2 %v72_v38  ;;  %252 = vmatpush.msra.mxu3 %v73_v39  ;;  %v53_v59 = vld [vmem:[%s3075_s1 + $0x38] sm:$0xff]  ;;  %v46_v60 = vld [vmem:[%s3075_s1] sm:$0xff]  ;;  %v47_v61 = vld [vmem:[%s3075_s1 + $0x8] sm:$0xff] }
  0x1c   :  { %130 = vmatpush.msra.mxu0 %v66_v40  ;;  %171 = vmatpush.msra.mxu1 %v67_v41  ;;  %v48_v62 = vld [vmem:[%s3075_s1 + $0x10] sm:$0xff]  ;;  %v49_v63 = vld [vmem:[%s3075_s1 + $0x18] sm:$0xff]  ;;  %v38_v0 = vld [vmem:[%s3074_s0] sm:$0xff] }
  0x1d   :  { %212 = vmatpush.msra.mxu2 %v68_v42  ;;  %253 = vmatpush.msra.mxu3 %v69_v43  ;;  %v2124_v1 = vld [vmem:[#allocation2 + $0x1e0] sm:$0xff]  ;;  %v2126_v2 = vld [vmem:[#allocation2 + $0x1e8] sm:$0xff]  ;;  %v2128_v3 = vld [vmem:[#allocation2 + $0x1f8] sm:$0xff] }
  0x1e   :  { %131 = vmatpush.msra.mxu0 %v62_v44  ;;  %172 = vmatpush.msra.mxu1 %v63_v45  ;;  %v2130_v4 = vld [vmem:[#allocation2 + $0x1f0] sm:$0xff]  ;;  %v2132_v5 = vld [vmem:[#allocation2 + $0x1c0] sm:$0xff]  ;;  %v2134_v6 = vld [vmem:[#allocation2 + $0x1c8] sm:$0xff] }
  0x1f   :  { %213 = vmatpush.msra.mxu2 %v64_v46  ;;  %254 = vmatpush.msra.mxu3 %v65_v47  ;;  %v2138_v7 = vld [vmem:[#allocation2 + $0x1d8] sm:$0xff]  ;;  %v2140_v8 = vld [vmem:[#allocation2 + $0x1d0] sm:$0xff]  ;;  %v2143_v9 = vld [vmem:[#allocation2 + $0x1a0] sm:$0xff] }
  0x20   :  { %132 = vmatpush.msra.mxu0 %v58_v48  ;;  %173 = vmatpush.msra.mxu1 %v59_v49  ;;  %v2145_v10 = vld [vmem:[#allocation2 + $0x1a8] sm:$0xff]  ;;  %v2150_v11 = vld [vmem:[#allocation2 + $0x1b8] sm:$0xff]  ;;  %v2152_v12 = vld [vmem:[#allocation2 + $0x1b0] sm:$0xff] }
  0x21   :  { %214 = vmatpush.msra.mxu2 %v60_v50  ;;  %255 = vmatpush.msra.mxu3 %v61_v51  ;;  %v39_v13 = vld [vmem:[%s3074_s0 + $0x8] sm:$0xff]  ;;  %v2161_v14 = vld [vmem:[#allocation2 + $0x180] sm:$0xff]  ;;  %v2167_v16 = vld [vmem:[#allocation2 + $0x198] sm:$0xff] }
  0x22   :  { %133 = vmatpush.msra.mxu0 %v54_v52  ;;  %174 = vmatpush.msra.mxu1 %v55_v53  ;;  %v2163_v15 = vld [vmem:[#allocation2 + $0x188] sm:$0xff]  ;;  %v2169_v17 = vld [vmem:[#allocation2 + $0x190] sm:$0xff]  ;;  %v2171_v18 = vld [vmem:[#allocation2 + $0x160] sm:$0xff] }
  0x23   :  { %215 = vmatpush.msra.mxu2 %v56_v54  ;;  %256 = vmatpush.msra.mxu3 %v57_v55  ;;  %v2173_v19 = vld [vmem:[#allocation2 + $0x168] sm:$0xff]  ;;  %v2177_v20 = vld [vmem:[#allocation2 + $0x178] sm:$0xff]  ;;  %v2179_v21 = vld [vmem:[#allocation2 + $0x170] sm:$0xff] }
  0x24   :  { %134 = vmatpush.msra.mxu0 %v50_v56  ;;  %175 = vmatpush.msra.mxu1 %v51_v57  ;;  %v2182_v22 = vld [vmem:[#allocation2 + $0x140] sm:$0xff]  ;;  %v2184_v23 = vld [vmem:[#allocation2 + $0x148] sm:$0xff]  ;;  %v2189_v24 = vld [vmem:[#allocation2 + $0x158] sm:$0xff] }
  0x25   :  { %216 = vmatpush.msra.mxu2 %v52_v58  ;;  %257 = vmatpush.msra.mxu3 %v53_v59  ;;  %v2191_v25 = vld [vmem:[#allocation2 + $0x150] sm:$0xff]  ;;  %v2200_v27 = vld [vmem:[#allocation2 + $0x120] sm:$0xff]  ;;  %v2202_v28 = vld [vmem:[#allocation2 + $0x128] sm:$0xff] }
  0x26   :  { %135 = vmatpush.msra.mxu0 %v46_v60  ;;  %176 = vmatpush.msra.mxu1 %v47_v61  ;;  %v40_v26 = vld [vmem:[%s3074_s0 + $0x10] sm:$0xff]  ;;  %v2206_v29 = vld [vmem:[#allocation2 + $0x138] sm:$0xff]  ;;  %v2210_v31 = vld [vmem:[#allocation2 + $0x100] sm:$0xff] }
  0x27   :  { %217 = vmatpush.msra.mxu2 %v48_v62  ;;  %258 = vmatpush.msra.mxu3 %v49_v63  ;;  %v2208_v30 = vld [vmem:[#allocation2 + $0x130] sm:$0xff]  ;;  %v2212_v32 = vld [vmem:[#allocation2 + $0x108] sm:$0xff]  ;;  %v2216_v33 = vld [vmem:[#allocation2 + $0x118] sm:$0xff] }
  0x28   :  { %136 = vmatmul.f32.vlgmr.msra.gmra.mxu0 %v38_v0  ;;  %177 = vmatmul.f32.vlgmr.msra.gmra.mxu1 %v38_v0  ;;  %v2218_v34 = vld [vmem:[#allocation2 + $0x110] sm:$0xff]  ;;  %v2221_v35 = vld [vmem:[#allocation2 + $0xe0] sm:$0xff]  ;;  %v2223_v36 = vld [vmem:[#allocation2 + $0xe8] sm:$0xff] }
  0x29   :  { %218 = vmatmul.f32.vlgmr.msra.gmra.mxu2 %v38_v0  ;;  %259 = vmatmul.f32.vlgmr.msra.gmra.mxu3 %v38_v0  ;;  %v2228_v37 = vld [vmem:[#allocation2 + $0xf8] sm:$0xff]  ;;  %v2230_v38 = vld [vmem:[#allocation2 + $0xf0] sm:$0xff]  ;;  %v2239_v40 = vld [vmem:[#allocation2 + $0xc0] sm:$0xff] }
  0x2a   :  { %348 = vmatpush.msrb.mxu0 %v2124_v1  ;;  %368 = vmatpush.msrb.mxu1 %v2126_v2  ;;  %v41_v39 = vld [vmem:[%s3074_s0 + $0x18] sm:$0xff]  ;;  %v2241_v41 = vld [vmem:[#allocation2 + $0xc8] sm:$0xff]  ;;  %v2247_v43 = vld [vmem:[#allocation2 + $0xd0] sm:$0xff] }
  0x2b   :  { %408 = vmatpush.msrb.mxu3 %v2128_v3  ;;  %388 = vmatpush.msrb.mxu2 %v2130_v4  ;;  %v2245_v42 = vld [vmem:[#allocation2 + $0xd8] sm:$0xff]  ;;  %3169 = vst [vmem:[#allocation12_spill] sm:$0xff] %v2247_v43  ;;  %v2249_v44 = vld [vmem:[#allocation2 + $0xa0] sm:$0xff]  ;;  %v2251_v45 = vld [vmem:[#allocation2 + $0xa8] sm:$0xff] }
  0x2c   :  { %349 = vmatpush.msrb.mxu0 %v2132_v5  ;;  %369 = vmatpush.msrb.mxu1 %v2134_v6  ;;  %3168 = vst [vmem:[#allocation11_spill] sm:$0xff] %v2245_v42  ;;  %v2255_v46 = vld [vmem:[#allocation2 + $0xb8] sm:$0xff]  ;;  %v2257_v47 = vld [vmem:[#allocation2 + $0xb0] sm:$0xff]  ;;  %v2260_v48 = vld [vmem:[#allocation2 + $0x80] sm:$0xff] }
  0x2d   :  { %409 = vmatpush.msrb.mxu3 %v2138_v7  ;;  %389 = vmatpush.msrb.mxu2 %v2140_v8  ;;  %3170 = vst [vmem:[#allocation13_spill] sm:$0xff] %v2249_v44  ;;  %v2262_v49 = vld [vmem:[#allocation2 + $0x88] sm:$0xff]  ;;  %v2267_v50 = vld [vmem:[#allocation2 + $0x98] sm:$0xff]  ;;  %v2269_v51 = vld [vmem:[#allocation2 + $0x90] sm:$0xff] }
  0x2e   :  { %350 = vmatpush.msrb.mxu0 %v2143_v9  ;;  %370 = vmatpush.msrb.mxu1 %v2145_v10  ;;  %3171 = vst [vmem:[#allocation14_spill] sm:$0xff] %v2251_v45  ;;  %v42_v52 = vld [vmem:[%s3074_s0 + $0x20] sm:$0xff]  ;;  %v2280_v54 = vld [vmem:[#allocation2 + $0x68] sm:$0xff]  ;;  %v2284_v55 = vld [vmem:[#allocation2 + $0x78] sm:$0xff] }
  0x2f   :  { %410 = vmatpush.msrb.mxu3 %v2150_v11  ;;  %390 = vmatpush.msrb.mxu2 %v2152_v12  ;;  %3172 = vst [vmem:[#allocation15_spill] sm:$0xff] %v2255_v46  ;;  %v2278_v53 = vld [vmem:[#allocation2 + $0x60] sm:$0xff]  ;;  %v2286_v56 = vld [vmem:[#allocation2 + $0x70] sm:$0xff]  ;;  %v2290_v58 = vld [vmem:[#allocation2 + $0x48] sm:$0xff] }
  0x30   :  { %139 = vmatmul.f32.gmra.mxu0 %v39_v13  ;;  %180 = vmatmul.f32.gmra.mxu1 %v39_v13  ;;  %3173 = vst [vmem:[#allocation16_spill] sm:$0xff] %v2257_v47  ;;  %v2288_v57 = vld [vmem:[#allocation2 + $0x40] sm:$0xff]  ;;  %v2294_v59 = vld [vmem:[#allocation2 + $0x58] sm:$0xff]  ;;  %v2296_v60 = vld [vmem:[#allocation2 + $0x50] sm:$0xff] }
  0x31   :  { %221 = vmatmul.f32.gmra.mxu2 %v39_v13  ;;  %262 = vmatmul.f32.gmra.mxu3 %v39_v13  ;;  %3174 = vst [vmem:[#allocation17_spill] sm:$0xff] %v2260_v48  ;;  %v2299_v61 = vld [vmem:[#allocation2 + $0x20] sm:$0xff]  ;;  %v2301_v62 = vld [vmem:[#allocation2 + $0x28] sm:$0xff]  ;;  %v2306_v63 = vld [vmem:[#allocation2 + $0x30] sm:$0xff] }
  0x32   :  { %351 = vmatpush.msrb.mxu0 %v2161_v14  ;;  %371 = vmatpush.msrb.mxu1 %v2163_v15  ;;  %3175 = vst [vmem:[#allocation18_spill] sm:$0xff] %v2262_v49  ;;  %v2308_v0 = vld [vmem:[#allocation2 + $0x38] sm:$0xff]  ;;  %v43_v13 = vld [vmem:[%s3074_s0 + $0x28] sm:$0xff] }
  0x33   :  { %411 = vmatpush.msrb.mxu3 %v2167_v16  ;;  %391 = vmatpush.msrb.mxu2 %v2169_v17  ;;  %3176 = vst [vmem:[#allocation19_spill] sm:$0xff] %v2267_v50 }
  0x34   :  { %352 = vmatpush.msrb.mxu0 %v2171_v18  ;;  %372 = vmatpush.msrb.mxu1 %v2173_v19  ;;  %3177 = vst [vmem:[#allocation20_spill] sm:$0xff] %v2269_v51 }
  0x35   :  { %412 = vmatpush.msrb.mxu3 %v2177_v20  ;;  %392 = vmatpush.msrb.mxu2 %v2179_v21  ;;  %3178 = vst [vmem:[#allocation21_spill] sm:$0xff] %v2278_v53 }
  0x36   :  { %353 = vmatpush.msrb.mxu0 %v2182_v22  ;;  %373 = vmatpush.msrb.mxu1 %v2184_v23  ;;  %3179 = vst [vmem:[#allocation22_spill] sm:$0xff] %v2280_v54 }
  0x37   :  { %413 = vmatpush.msrb.mxu3 %v2189_v24  ;;  %393 = vmatpush.msrb.mxu2 %v2191_v25  ;;  %3180 = vst [vmem:[#allocation23_spill] sm:$0xff] %v2284_v55 }
  0x38   :  { %142 = vmatmul.f32.gmra.mxu0 %v40_v26  ;;  %183 = vmatmul.f32.gmra.mxu1 %v40_v26  ;;  %3181 = vst [vmem:[#allocation24_spill] sm:$0xff] %v2286_v56 }
  0x39   :  { %224 = vmatmul.f32.gmra.mxu2 %v40_v26  ;;  %265 = vmatmul.f32.gmra.mxu3 %v40_v26  ;;  %3182 = vst [vmem:[#allocation25_spill] sm:$0xff] %v2288_v57  ;;  %v2317_v26 = vld [vmem:[#allocation2] sm:$0xff] }
  0x3a   :  { %354 = vmatpush.msrb.mxu0 %v2200_v27  ;;  %374 = vmatpush.msrb.mxu1 %v2202_v28  ;;  %3183 = vst [vmem:[#allocation26_spill] sm:$0xff] %v2290_v58 }
  0x3b   :  { %414 = vmatpush.msrb.mxu3 %v2206_v29  ;;  %394 = vmatpush.msrb.mxu2 %v2208_v30  ;;  %3184 = vst [vmem:[#allocation27_spill] sm:$0xff] %v2294_v59 }
  0x3c   :  { %355 = vmatpush.msrb.mxu0 %v2210_v31  ;;  %375 = vmatpush.msrb.mxu1 %v2212_v32  ;;  %3185 = vst [vmem:[#allocation28_spill] sm:$0xff] %v2296_v60 }
  0x3d   :  { %415 = vmatpush.msrb.mxu3 %v2216_v33  ;;  %395 = vmatpush.msrb.mxu2 %v2218_v34  ;;  %3186 = vst [vmem:[#allocation29_spill] sm:$0xff] %v2299_v61 }
  0x3e   :  { %356 = vmatpush.msrb.mxu0 %v2221_v35  ;;  %376 = vmatpush.msrb.mxu1 %v2223_v36  ;;  %3187 = vst [vmem:[#allocation30_spill] sm:$0xff] %v2301_v62 }
  0x3f   :  { %416 = vmatpush.msrb.mxu3 %v2228_v37  ;;  %396 = vmatpush.msrb.mxu2 %v2230_v38  ;;  %3188 = vst [vmem:[#allocation31_spill] sm:$0xff] %v2306_v63 }
  0x40   :  { %145 = vmatmul.f32.gmra.mxu0 %v41_v39  ;;  %186 = vmatmul.f32.gmra.mxu1 %v41_v39  ;;  %3189 = vst [vmem:[#allocation32_spill] sm:$0xff] %v2308_v0 }
  0x41   :  { %227 = vmatmul.f32.gmra.mxu2 %v41_v39  ;;  %268 = vmatmul.f32.gmra.mxu3 %v41_v39  ;;  %3190 = vst [vmem:[#allocation33_spill] sm:$0xff] %v2317_v26  ;;  %v2319_v39 = vld [vmem:[#allocation2 + $0x8] sm:$0xff] }
  0x42   :  { %357 = vmatpush.msrb.mxu0 %v2239_v40  ;;  %377 = vmatpush.msrb.mxu1 %v2241_v41  ;;  %3191 = vst [vmem:[#allocation34_spill] sm:$0xff] %v2319_v39 }
  0x43   :  { %417 = vmatpush.msrb.mxu3 %v2245_v42  ;;  %397 = vmatpush.msrb.mxu2 %v2247_v43 }
  0x44   :  { %358 = vmatpush.msrb.mxu0 %v2249_v44  ;;  %378 = vmatpush.msrb.mxu1 %v2251_v45 }
  0x45   :  { %418 = vmatpush.msrb.mxu3 %v2255_v46  ;;  %398 = vmatpush.msrb.mxu2 %v2257_v47 }
  0x46   :  { %359 = vmatpush.msrb.mxu0 %v2260_v48  ;;  %379 = vmatpush.msrb.mxu1 %v2262_v49 }
  0x47   :  { %419 = vmatpush.msrb.mxu3 %v2267_v50  ;;  %399 = vmatpush.msrb.mxu2 %v2269_v51 }
  0x48   :  { %148 = vmatmul.f32.gmra.mxu0 %v42_v52  ;;  %189 = vmatmul.f32.gmra.mxu1 %v42_v52 }
  0x49   :  { %230 = vmatmul.f32.gmra.mxu2 %v42_v52  ;;  %271 = vmatmul.f32.gmra.mxu3 %v42_v52  ;;  %v2323_v52 = vld [vmem:[#allocation2 + $0x10] sm:$0xff] }
  0x4a   :  { %360 = vmatpush.msrb.mxu0 %v2278_v53  ;;  %380 = vmatpush.msrb.mxu1 %v2280_v54  ;;  %3192 = vst [vmem:[#allocation35_spill] sm:$0xff] %v2323_v52 }
  0x4b   :  { %420 = vmatpush.msrb.mxu3 %v2284_v55  ;;  %400 = vmatpush.msrb.mxu2 %v2286_v56 }
  0x4c   :  { %361 = vmatpush.msrb.mxu0 %v2288_v57  ;;  %381 = vmatpush.msrb.mxu1 %v2290_v58  ;;  %v2325_v58 = vld [vmem:[#allocation2 + $0x18] sm:$0xff] }
  0x4d   :  { %421 = vmatpush.msrb.mxu3 %v2294_v59  ;;  %401 = vmatpush.msrb.mxu2 %v2296_v60  ;;  %3193 = vst [vmem:[#allocation36_spill] sm:$0xff] %v2325_v58 }
  0x4e   :  { %362 = vmatpush.msrb.mxu0 %v2299_v61  ;;  %382 = vmatpush.msrb.mxu1 %v2301_v62 }
  0x4f   :  { %402 = vmatpush.msrb.mxu2 %v2306_v63  ;;  %422 = vmatpush.msrb.mxu3 %v2308_v0  ;;  %v44_v0 = vld [vmem:[%s3074_s0 + $0x30] sm:$0xff] }
  0x50   :  { %151 = vmatmul.f32.gmra.mxu0 %v43_v13  ;;  %192 = vmatmul.f32.gmra.mxu1 %v43_v13 }
  0x51   :  { %233 = vmatmul.f32.gmra.mxu2 %v43_v13  ;;  %274 = vmatmul.f32.gmra.mxu3 %v43_v13  ;;  %v45_v13 = vld [vmem:[%s3074_s0 + $0x38] sm:$0xff] }
  0x52   :  { %363 = vmatpush.msrb.mxu0 %v2317_v26  ;;  %383 = vmatpush.msrb.mxu1 %v2319_v39 }
  0x53   :  { %403 = vmatpush.msrb.mxu2 %v2323_v52  ;;  %423 = vmatpush.msrb.mxu3 %v2325_v58 }
  0x54   :  { %496 = vmatpush.msra.mxu0 %v2124_v1  ;;  %516 = vmatpush.msra.mxu1 %v2126_v2 }
  0x55   :  { %536 = vmatpush.msra.mxu2 %v2130_v4  ;;  %556 = vmatpush.msra.mxu3 %v2128_v3 }
  0x56   :  { %497 = vmatpush.msra.mxu0 %v2132_v5  ;;  %517 = vmatpush.msra.mxu1 %v2134_v6 }
  0x57   :  { %537 = vmatpush.msra.mxu2 %v2140_v8  ;;  %557 = vmatpush.msra.mxu3 %v2138_v7 }
  0x58   :  { %154 = vmatmul.f32.gmra.mxu0 %v44_v0  ;;  %195 = vmatmul.f32.gmra.mxu1 %v44_v0 }
  0x59   :  { %236 = vmatmul.f32.gmra.mxu2 %v44_v0  ;;  %277 = vmatmul.f32.gmra.mxu3 %v44_v0  ;;  %v1888_v0 = vmov 0.0  }
  0x5a   :  { %498 = vmatpush.msra.mxu0 %v2143_v9  ;;  %518 = vmatpush.msra.mxu1 %v2145_v10 }
  0x5b   :  { %538 = vmatpush.msra.mxu2 %v2152_v12  ;;  %558 = vmatpush.msra.mxu3 %v2150_v11 }
  0x5c   :  { %499 = vmatpush.msra.mxu0 %v2161_v14  ;;  %519 = vmatpush.msra.mxu1 %v2163_v15 }
  0x5d   :  { %539 = vmatpush.msra.mxu2 %v2169_v17  ;;  %559 = vmatpush.msra.mxu3 %v2167_v16 }
  0x5e   :  { %500 = vmatpush.msra.mxu0 %v2171_v18  ;;  %520 = vmatpush.msra.mxu1 %v2173_v19 }
  0x5f   :  { %540 = vmatpush.msra.mxu2 %v2179_v21  ;;  %560 = vmatpush.msra.mxu3 %v2177_v20 }
  0x60   :  { %157 = vmatmul.f32.gmra.mxu0 %v45_v13  ;;  %198 = vmatmul.f32.gmra.mxu1 %v45_v13 }
  0x61   :  { %239 = vmatmul.f32.gmra.mxu2 %v45_v13  ;;  %280 = vmatmul.f32.gmra.mxu3 %v45_v13  ;;  %v3194_v13 = vld [vmem:[#allocation26_spill] sm:$0xff] }
  0x62   :  { %501 = vmatpush.msra.mxu0 %v2182_v22  ;;  %521 = vmatpush.msra.mxu1 %v2184_v23 }
  0x63   :  { %541 = vmatpush.msra.mxu2 %v2191_v25  ;;  %561 = vmatpush.msra.mxu3 %v2189_v24 }
  0x64   :  { %502 = vmatpush.msra.mxu0 %v2200_v27  ;;  %522 = vmatpush.msra.mxu1 %v2202_v28 }
  0x65   :  { %542 = vmatpush.msra.mxu2 %v2208_v30  ;;  %562 = vmatpush.msra.mxu3 %v2206_v29 }
  0x66   :  { %503 = vmatpush.msra.mxu0 %v2210_v31  ;;  %523 = vmatpush.msra.mxu1 %v2212_v32 }
  0x67   :  { %543 = vmatpush.msra.mxu2 %v2218_v34  ;;  %563 = vmatpush.msra.mxu3 %v2216_v33 }
  0x68   :  { %364 = vmatmul.f32.vlgmr.msrb.gmra.mxu0 %v1888_v0  ;;  %384 = vmatmul.f32.vlgmr.msrb.gmra.mxu1 %v1888_v0 }
  0x69   :  { %404 = vmatmul.f32.vlgmr.msrb.gmra.mxu2 %v1888_v0  ;;  %424 = vmatmul.f32.vlgmr.msrb.gmra.mxu3 %v1888_v0  ;;  %v3195_v0 = vld [vmem:[#allocation32_spill] sm:$0xff] }
  0x6a   :  { %504 = vmatpush.msra.mxu0 %v2221_v35  ;;  %524 = vmatpush.msra.mxu1 %v2223_v36 }
  0x6b   :  { %544 = vmatpush.msra.mxu2 %v2230_v38  ;;  %564 = vmatpush.msra.mxu3 %v2228_v37 }
  0x6c   :  { %505 = vmatpush.msra.mxu0 %v2239_v40  ;;  %525 = vmatpush.msra.mxu1 %v2241_v41 }
  0x6d   :  { %545 = vmatpush.msra.mxu2 %v2247_v43  ;;  %565 = vmatpush.msra.mxu3 %v2245_v42 }
  0x6e   :  { %506 = vmatpush.msra.mxu0 %v2249_v44  ;;  %526 = vmatpush.msra.mxu1 %v2251_v45 }
  0x6f   :  { %546 = vmatpush.msra.mxu2 %v2257_v47  ;;  %566 = vmatpush.msra.mxu3 %v2255_v46 }
  0x70   :  { %507 = vmatpush.msra.mxu0 %v2260_v48  ;;  %527 = vmatpush.msra.mxu1 %v2262_v49 }
  0x71   :  { %547 = vmatpush.msra.mxu2 %v2269_v51  ;;  %567 = vmatpush.msra.mxu3 %v2267_v50 }
  0x72   :  { %508 = vmatpush.msra.mxu0 %v2278_v53  ;;  %528 = vmatpush.msra.mxu1 %v2280_v54 }
  0x73   :  { %548 = vmatpush.msra.mxu2 %v2286_v56  ;;  %568 = vmatpush.msra.mxu3 %v2284_v55 }
  0x74   :  { %509 = vmatpush.msra.mxu0 %v2288_v57  ;;  %529 = vmatpush.msra.mxu1 %v3194_v13 }
  0x75   :  { %549 = vmatpush.msra.mxu2 %v2296_v60  ;;  %569 = vmatpush.msra.mxu3 %v2294_v59 }
  0x76   :  { %510 = vmatpush.msra.mxu0 %v2299_v61  ;;  %530 = vmatpush.msra.mxu1 %v2301_v62 }
  0x77   :  { %550 = vmatpush.msra.mxu2 %v2306_v63  ;;  %570 = vmatpush.msra.mxu3 %v3195_v0 }
  0x78   :  { %511 = vmatpush.msra.mxu0 %v2317_v26  ;;  %531 = vmatpush.msra.mxu1 %v2319_v39 }
  0x79   :  { %551 = vmatpush.msra.mxu2 %v2323_v52  ;;  %571 = vmatpush.msra.mxu3 %v2325_v58 }
  0x7a   :  { %645 = vmatpush.msrb.mxu0 %v2124_v1  ;;  %665 = vmatpush.msrb.mxu1 %v2126_v2 }
  0x7b   :  { %685 = vmatpush.msrb.mxu2 %v2130_v4  ;;  %705 = vmatpush.msrb.mxu3 %v2128_v3 }
  0x7c   :  { %646 = vmatpush.msrb.mxu0 %v2132_v5  ;;  %666 = vmatpush.msrb.mxu1 %v2134_v6 }
  0x7d   :  { %686 = vmatpush.msrb.mxu2 %v2140_v8  ;;  %706 = vmatpush.msrb.mxu3 %v2138_v7 }
  0x7e   :  { %647 = vmatpush.msrb.mxu0 %v2143_v9  ;;  %667 = vmatpush.msrb.mxu1 %v2145_v10 }
  0x7f   :  { %687 = vmatpush.msrb.mxu2 %v2152_v12  ;;  %707 = vmatpush.msrb.mxu3 %v2150_v11 }
  0x80   :  { %648 = vmatpush.msrb.mxu0 %v2161_v14  ;;  %668 = vmatpush.msrb.mxu1 %v2163_v15 }
  0x81   :  { %688 = vmatpush.msrb.mxu2 %v2169_v17  ;;  %708 = vmatpush.msrb.mxu3 %v2167_v16 }
  0x82   :  { %649 = vmatpush.msrb.mxu0 %v2171_v18  ;;  %669 = vmatpush.msrb.mxu1 %v2173_v19 }
  0x83   :  { %689 = vmatpush.msrb.mxu2 %v2179_v21  ;;  %709 = vmatpush.msrb.mxu3 %v2177_v20 }
  0x84   :  { %650 = vmatpush.msrb.mxu0 %v2182_v22  ;;  %670 = vmatpush.msrb.mxu1 %v2184_v23 }
  0x85   :  { %690 = vmatpush.msrb.mxu2 %v2191_v25  ;;  %710 = vmatpush.msrb.mxu3 %v2189_v24 }
  0x86   :  { %651 = vmatpush.msrb.mxu0 %v2200_v27  ;;  %671 = vmatpush.msrb.mxu1 %v2202_v28 }
  0x87   :  { %691 = vmatpush.msrb.mxu2 %v2208_v30  ;;  %711 = vmatpush.msrb.mxu3 %v2206_v29 }
  0x88   :  { %652 = vmatpush.msrb.mxu0 %v2210_v31  ;;  %672 = vmatpush.msrb.mxu1 %v2212_v32 }
  0x89   :  { %692 = vmatpush.msrb.mxu2 %v2218_v34  ;;  %712 = vmatpush.msrb.mxu3 %v2216_v33 }
  0x8a   :  { %653 = vmatpush.msrb.mxu0 %v2221_v35  ;;  %673 = vmatpush.msrb.mxu1 %v2223_v36 }
  0x8b   :  { %693 = vmatpush.msrb.mxu2 %v2230_v38  ;;  %713 = vmatpush.msrb.mxu3 %v2228_v37 }
  0x8c   :  { %654 = vmatpush.msrb.mxu0 %v2239_v40  ;;  %674 = vmatpush.msrb.mxu1 %v2241_v41 }
  0x8d   :  { %694 = vmatpush.msrb.mxu2 %v2247_v43  ;;  %714 = vmatpush.msrb.mxu3 %v2245_v42 }
  0x8e   :  { %655 = vmatpush.msrb.mxu0 %v2249_v44  ;;  %675 = vmatpush.msrb.mxu1 %v2251_v45 }
  0x8f   :  { %695 = vmatpush.msrb.mxu2 %v2257_v47  ;;  %715 = vmatpush.msrb.mxu3 %v2255_v46 }
  0x90   :  { %656 = vmatpush.msrb.mxu0 %v2260_v48  ;;  %676 = vmatpush.msrb.mxu1 %v2262_v49 }
  0x91   :  { %696 = vmatpush.msrb.mxu2 %v2269_v51  ;;  %716 = vmatpush.msrb.mxu3 %v2267_v50 }
  0x92   :  { %657 = vmatpush.msrb.mxu0 %v2278_v53  ;;  %677 = vmatpush.msrb.mxu1 %v2280_v54 }
  0x93   :  { %697 = vmatpush.msrb.mxu2 %v2286_v56  ;;  %717 = vmatpush.msrb.mxu3 %v2284_v55 }
  0x94   :  { %658 = vmatpush.msrb.mxu0 %v2288_v57  ;;  %678 = vmatpush.msrb.mxu1 %v3194_v13 }
  0x95   :  { %698 = vmatpush.msrb.mxu2 %v2296_v60  ;;  %718 = vmatpush.msrb.mxu3 %v2294_v59 }
  0x96   :  { %659 = vmatpush.msrb.mxu0 %v2299_v61  ;;  %679 = vmatpush.msrb.mxu1 %v2301_v62  ;;  %v110_v61 = vld [vmem:[%s3077_s3] sm:$0xf] }
  0x97   :  { %699 = vmatpush.msrb.mxu2 %v2306_v63  ;;  %719 = vmatpush.msrb.mxu3 %v3195_v0  ;;  %v112_v59 = vperm.slane %v110_v61, 0  ;;  %v113_v62 = vperm.slane %v110_v61, 1 }
  0x98   :  { %660 = vmatpush.msrb.mxu0 %v2317_v26  ;;  %680 = vmatpush.msrb.mxu1 %v2319_v39 }
  0x99   :  { %700 = vmatpush.msrb.mxu2 %v2323_v52  ;;  %720 = vmatpush.msrb.mxu3 %v2325_v58  ;;  %v2476_v52 = vperm.slane %v110_v61, 2  ;;  %v115_v58 = vperm.slane %v110_v61, 3 }
  0xa5   :  { %v137_v13 = vpop.f32.mrf.mxu0  ;;  %v178_v60 = vpop.f32.mrf.mxu1 }
  0xac   :  { %v2468_v57 = vpop.f32.mrf.mxu2  ;;  %v2470_v63 = vpop.f32.mrf.mxu3 }
  0xad   :  { %v140_v0 = vpop.f32.mrf.mxu0  ;;  %v181_v26 = vpop.f32.mrf.mxu1 }
  0xae   :  { %v2472_v55 = vadd.f32 %v140_v0, %v112_v59  ;;  %v2474_v39 = vadd.f32 %v181_v26, %v113_v62 }
  0xb0   :  { %3196 = vst [vmem:[#allocation37_spill] sm:$0xff] %v2472_v55 }
  0xb1   :  { %3197 = vst [vmem:[#allocation38_spill] sm:$0xff] %v2474_v39 }
  0xb4   :  { %v222_v56 = vpop.f32.mrf.mxu2  ;;  %v263_v54 = vpop.f32.mrf.mxu3 }
  0xb5   :  { %v2479_v53 = vadd.f32 %v222_v56, %v2476_v52  ;;  %v2481_v50 = vadd.f32 %v263_v54, %v115_v58  ;;  %v143_v51 = vpop.f32.mrf.mxu0  ;;  %v184_v49 = vpop.f32.mrf.mxu1 }
  0xb6   :  { %v2483_v48 = vadd.f32 %v143_v51, %v112_v59  ;;  %v2485_v46 = vadd.f32 %v184_v49, %v113_v62 }
  0xb7   :  { %3198 = vst [vmem:[#allocation39_spill] sm:$0xff] %v2479_v53 }
  0xb8   :  { %3199 = vst [vmem:[#allocation40_spill] sm:$0xff] %v2481_v50 }
  0xb9   :  { %3200 = vst [vmem:[#allocation41_spill] sm:$0xff] %v2483_v48 }
  0xba   :  { %3201 = vst [vmem:[#allocation42_spill] sm:$0xff] %v2485_v46 }
  0xbc   :  { %v225_v0 = vpop.f32.mrf.mxu2  ;;  %v266_v55 = vpop.f32.mrf.mxu3 }
  0xbd   :  { %v2488_v26 = vadd.f32 %v225_v0, %v2476_v52  ;;  %v2490_v39 = vadd.f32 %v266_v55, %v115_v58  ;;  %v146_v61 = vpop.f32.mrf.mxu0  ;;  %v187_v47 = vpop.f32.mrf.mxu1 }
  0xbe   :  { %v2492_v45 = vadd.f32 %v146_v61, %v112_v59  ;;  %v2494_v56 = vadd.f32 %v187_v47, %v113_v62 }
  0xbf   :  { %3202 = vst [vmem:[#allocation43_spill] sm:$0xff] %v2488_v26 }
  0xc0   :  { %3203 = vst [vmem:[#allocation44_spill] sm:$0xff] %v2490_v39 }
  0xc1   :  { %3204 = vst [vmem:[#allocation45_spill] sm:$0xff] %v2492_v45 }
  0xc2   :  { %3205 = vst [vmem:[#allocation46_spill] sm:$0xff] %v2494_v56 }
  0xc4   :  { %v228_v54 = vpop.f32.mrf.mxu2  ;;  %v269_v53 = vpop.f32.mrf.mxu3 }
  0xc5   :  { %v2497_v51 = vadd.f32 %v228_v54, %v2476_v52  ;;  %v2499_v49 = vadd.f32 %v269_v53, %v115_v58  ;;  %v149_v46 = vpop.f32.mrf.mxu0  ;;  %v190_v48 = vpop.f32.mrf.mxu1 }
  0xc6   :  { %v2501_v50 = vadd.f32 %v149_v46, %v112_v59  ;;  %v2503_v0 = vadd.f32 %v190_v48, %v113_v62 }
  0xc7   :  { %3206 = vst [vmem:[#allocation47_spill] sm:$0xff] %v2497_v51 }
  0xc8   :  { %3207 = vst [vmem:[#allocation48_spill] sm:$0xff] %v2499_v49 }
  0xc9   :  { %3208 = vst [vmem:[#allocation49_spill] sm:$0xff] %v2501_v50 }
  0xca   :  { %3209 = vst [vmem:[#allocation50_spill] sm:$0xff] %v2503_v0 }
  0xcc   :  { %v231_v55 = vpop.f32.mrf.mxu2  ;;  %v272_v26 = vpop.f32.mrf.mxu3 }
  0xcd   :  { %v2506_v61 = vadd.f32 %v231_v55, %v2476_v52  ;;  %v2508_v47 = vadd.f32 %v272_v26, %v115_v58  ;;  %v152_v56 = vpop.f32.mrf.mxu0  ;;  %v193_v45 = vpop.f32.mrf.mxu1 }
  0xce   :  { %v2510_v39 = vadd.f32 %v152_v56, %v112_v59  ;;  %v2512_v54 = vadd.f32 %v193_v45, %v113_v62 }
  0xcf   :  { %3210 = vst [vmem:[#allocation51_spill] sm:$0xff] %v2506_v61 }
  0xd0   :  { %3211 = vst [vmem:[#allocation52_spill] sm:$0xff] %v2508_v47 }
  0xd1   :  { %3212 = vst [vmem:[#allocation53_spill] sm:$0xff] %v2510_v39 }
  0xd2   :  { %3213 = vst [vmem:[#allocation54_spill] sm:$0xff] %v2512_v54 }
  0xd4   :  { %v234_v53 = vpop.f32.mrf.mxu2  ;;  %v275_v51 = vpop.f32.mrf.mxu3 }
  0xd5   :  { %v2515_v46 = vadd.f32 %v234_v53, %v2476_v52  ;;  %v2517_v48 = vadd.f32 %v275_v51, %v115_v58  ;;  %v155_v0 = vpop.f32.mrf.mxu0  ;;  %v196_v50 = vpop.f32.mrf.mxu1  ;;  %v138_v51 = vadd.f32 %v137_v13, %v112_v59 }
  0xd6   :  { %v2519_v49 = vadd.f32 %v155_v0, %v112_v59  ;;  %v2521_v55 = vadd.f32 %v196_v50, %v113_v62 }
  0xd7   :  { %3214 = vst [vmem:[#allocation55_spill] sm:$0xff] %v2515_v46  ;;  %v179_v46 = vadd.f32 %v178_v60, %v113_v62 }
  0xd8   :  { %3215 = vst [vmem:[#allocation56_spill] sm:$0xff] %v2517_v48 }
  0xd9   :  { %3216 = vst [vmem:[#allocation57_spill] sm:$0xff] %v2519_v49 }
  0xda   :  { %3217 = vst [vmem:[#allocation58_spill] sm:$0xff] %v2521_v55 }
  0xdc   :  { %v237_v26 = vpop.f32.mrf.mxu2  ;;  %v278_v61 = vpop.f32.mrf.mxu3 }
  0xdd   :  { %v2524_v56 = vadd.f32 %v237_v26, %v2476_v52  ;;  %v2526_v45 = vadd.f32 %v278_v61, %v115_v58  ;;  %v158_v54 = vpop.f32.mrf.mxu0  ;;  %v199_v39 = vpop.f32.mrf.mxu1 }
  0xde   :  { %v2528_v47 = vadd.f32 %v158_v54, %v112_v59  ;;  %v2530_v53 = vadd.f32 %v199_v39, %v113_v62  ;;  %v261_v54 = vadd.f32 %v2470_v63, %v115_v58 }
  0xdf   :  { %3218 = vst [vmem:[#allocation59_spill] sm:$0xff] %v2524_v56 }
  0xe0   :  { %3219 = vst [vmem:[#allocation60_spill] sm:$0xff] %v2526_v45 }
  0xe1   :  { %3220 = vst [vmem:[#allocation61_spill] sm:$0xff] %v2528_v47 }
  0xe2   :  { %3221 = vst [vmem:[#allocation62_spill] sm:$0xff] %v2530_v53 }
  0xe4   :  { %v240_v48 = vpop.f32.mrf.mxu2  ;;  %v281_v0 = vpop.f32.mrf.mxu3 }
  0xe5   :  { %v2533_v50 = vadd.f32 %v240_v48, %v2476_v52  ;;  %v2535_v55 = vadd.f32 %v281_v0, %v115_v58  ;;  %v365_v49 = vpop.f32.mrf.mxu0  ;;  %v385_v26 = vpop.f32.mrf.mxu1 }
  0xe6   :  { %v428_v56 = vadd.f32 %v365_v49, %v138_v51  ;;  %v429_v61 = vadd.f32 %v385_v26, %v179_v46  ;;  %v220_v49 = vadd.f32 %v2468_v57, %v2476_v52 }
  0xe7   :  { %3222 = vst [vmem:[#allocation63_spill] sm:$0xff] %v2533_v50 }
  0xe8   :  { %3223 = vst [vmem:[#allocation64_spill] sm:$0xff] %v2535_v55  ;;  %v1578_v45 = vmul.f32 -1.442695, %v428_v56  ;;  %v1579_v44 = vmul.f32 -1.442695, %v429_v61 }
  0xea   :  { %1615 = vpow2.f32 %v1578_v45 }
  0xeb   :  { %1617 = vpow2.f32 %v1579_v44 }
  0xec   :  { %v425_v39 = vpop.f32.mrf.mxu3  ;;  %v405_v0 = vpop.f32.mrf.mxu2 }
  0xed   :  { %v431_v59 = vadd.f32 %v425_v39, %v261_v54  ;;  %v430_v45 = vadd.f32 %v405_v0, %v220_v49 }
  0xef   :  { %v1580_v60 = vmul.f32 -1.442695, %v431_v59 }
  0xf0   :  { %v1616_v62 = vpop.eup %1615 }
  0xf1   :  { %v1618_v13 = vpop.eup %1617  ;;  %v435_v53 = vadd.f32 1.0, %v1616_v62  ;;  %1619 = vpow2.f32 %v1580_v60 }
  0xf2   :  { %v454_v48 = vadd.f32 1.0, %v1618_v13 }
  0xf3   :  { %1621 = vrcp.f32 %v435_v53  ;;  %v447_v61 = vand.u32 2147483648, %v435_v53  ;;  %v445_v59 = vand.u32 2147483647, %v435_v53  ;;  %vm441_vm2 = vweird.f32 %v435_v53 }
  0xf4   :  { %1623 = vrcp.f32 %v454_v48  ;;  %v466_v54 = vand.u32 2147483648, %v454_v48  ;;  %v464_v62 = vand.u32 2147483647, %v454_v48  ;;  %vm460_vm3 = vweird.f32 %v454_v48 }
  0xf5   :  { %v448_v52 = vor.u32 1.1754944e-38, %v447_v61  ;;  %vm446_vm5 = vcmp.eq.f32.partialorder %v445_v59, 8.507059e+37 }
  0xf6   :  { %v467_v49 = vor.u32 1.1754944e-38, %v466_v54  ;;  %vm465_vm7 = vcmp.eq.f32.partialorder %v464_v62, 8.507059e+37 }
  0xf7   :  { %v1620_v50 = vpop.eup %1619 }
  0xf8   :  { %v474_v46 = vadd.f32 1.0, %v1620_v50 }
  0xf9   :  { %v1622_v56 = vpop.eup %1621 }
  0xfa   :  { %v1624_v58 = vpop.eup %1623  ;;  %v437_v44 = vmul.f32 %v1622_v56, %v435_v53  ;;  %1625 = vrcp.f32 %v474_v46  ;;  %vm442_vm0 = vweird.f32 %v1622_v56  ;;  %vm480_vm9 = vweird.f32 %v474_v46 }
  0xfb   :  { %v456_v63 = vmul.f32 %v1624_v58, %v454_v48  ;;  %1627 = vtanh.f32 %v430_v45  ;;  %vm461_vm1 = vweird.f32 %v1624_v58  ;;  %vm443_vm4 = vmor %vm441_vm2, %vm442_vm0  ;;  %v486_v48 = vand.u32 2147483648, %v474_v46 }
  0xfc   :  { %v438_v51 = vsub.f32 1.0, %v437_v44  ;;  %vm462_vm6 = vmor %vm460_vm3, %vm461_vm1 }
  0xfd   :  { %v457_v26 = vsub.f32 1.0, %v456_v63  ;;  %v487_v54 = vor.u32 1.1754944e-38, %v486_v48 }
  0xfe   :  { %v439_v39 = vmul.f32 %v1622_v56, %v438_v51 }
  0xff   :  { %v458_v60 = vmul.f32 %v1624_v58, %v457_v26 }
 0x100   :  { %v1626_v13 = vpop.eup %1625  ;;  %v440_v57 = vadd.f32 %v1622_v56, %v439_v39 }
 0x101   :  { %v459_v50 = vadd.f32 %v1624_v58, %v458_v60  ;;  %v476_v0 = vmul.f32 %v1626_v13, %v474_v46  ;;  %v1628_v45 = vpop.eup %1627  ;;  %vm481_vm8 = vweird.f32 %v1626_v13 }
 0x102   :  { %v444_v44 = vsel %vm443_vm4, %v1622_v56, %v440_v57  ;;  %v484_v56 = vand.u32 2147483647, %v474_v46  ;;  %vm482_vm10 = vmor %vm480_vm9, %vm481_vm8 }
 0x103   :  { %v449_v63 = vsel %vm446_vm5, %v448_v52, %v444_v44  ;;  %v463_v51 = vsel %vm462_vm6, %v1624_v58, %v459_v50  ;;  %v477_v55 = vsub.f32 1.0, %v476_v0  ;;  %v3253_v52 = vld [vmem:[#allocation39_spill] sm:$0xff] }
 0x104   :  { %v468_v26 = vsel %vm465_vm7, %v467_v49, %v463_v51  ;;  %v491_v47 = vmul.f32 %v1628_v45, %v449_v63  ;;  %vm485_vm11 = vcmp.eq.f32.partialorder %v484_v56, 8.507059e+37 }
 0x105   :  { %v490_v42 = vmul.f32 0.0, %v468_v26  ;;  %v478_v43 = vmul.f32 %v1626_v13, %v477_v55 }
 0x107   :  { %v2540_v39 = vadd.f32 %v491_v47, %v490_v42  ;;  %v479_v53 = vadd.f32 %v1626_v13, %v478_v43 }
 0x109   :  { %1629 = vtanh.f32 %v2540_v39  ;;  %v483_v61 = vsel %vm482_vm10, %v1626_v13, %v479_v53 }
 0x10a   :  { %v488_v59 = vsel %vm485_vm11, %v487_v54, %v483_v61 }
 0x10f   :  { %v1630_v58 = vpop.eup %1629 }
 0x110   :  { %v494_v60 = vmul.f32 %v1630_v58, %v488_v59 }
 0x112   :  { %495 = vst [vmem:[%s3078_s4] sm:$0xff] %v494_v60  ;;  %512 = vmatmul.f32.vlgmr.msra.gmra.mxu0 %v494_v60  ;;  %532 = vmatmul.f32.vlgmr.msra.gmra.mxu1 %v494_v60 }
 0x113   :  { %552 = vmatmul.f32.vlgmr.msra.gmra.mxu2 %v494_v60  ;;  %572 = vmatmul.f32.vlgmr.msra.gmra.mxu3 %v494_v60 }
 0x114   :  { %794 = vmatpush.msra.mxu0 %v2124_v1  ;;  %814 = vmatpush.msra.mxu1 %v2126_v2  ;;  %v3224_v1 = vld [vmem:[#allocation12_spill] sm:$0xff]  ;;  %v3225_v2 = vld [vmem:[#allocation11_spill] sm:$0xff] }
 0x115   :  { %834 = vmatpush.msra.mxu2 %v2130_v4  ;;  %854 = vmatpush.msra.mxu3 %v2128_v3  ;;  %v3226_v3 = vld [vmem:[#allocation13_spill] sm:$0xff]  ;;  %v3227_v4 = vld [vmem:[#allocation14_spill] sm:$0xff] }
 0x116   :  { %795 = vmatpush.msra.mxu0 %v2132_v5  ;;  %815 = vmatpush.msra.mxu1 %v2134_v6  ;;  %v3228_v5 = vld [vmem:[#allocation16_spill] sm:$0xff]  ;;  %v3229_v6 = vld [vmem:[#allocation15_spill] sm:$0xff] }
 0x117   :  { %835 = vmatpush.msra.mxu2 %v2140_v8  ;;  %855 = vmatpush.msra.mxu3 %v2138_v7  ;;  %v3230_v7 = vld [vmem:[#allocation17_spill] sm:$0xff]  ;;  %v3231_v8 = vld [vmem:[#allocation18_spill] sm:$0xff] }
 0x118   :  { %796 = vmatpush.msra.mxu0 %v2143_v9  ;;  %816 = vmatpush.msra.mxu1 %v2145_v10  ;;  %v3232_v9 = vld [vmem:[#allocation20_spill] sm:$0xff]  ;;  %v3233_v10 = vld [vmem:[#allocation19_spill] sm:$0xff] }
 0x119   :  { %836 = vmatpush.msra.mxu2 %v2152_v12  ;;  %856 = vmatpush.msra.mxu3 %v2150_v11  ;;  %v3234_v11 = vld [vmem:[#allocation21_spill] sm:$0xff]  ;;  %v3235_v12 = vld [vmem:[#allocation22_spill] sm:$0xff] }
 0x11a   :  { %797 = vmatpush.msra.mxu0 %v2161_v14  ;;  %817 = vmatpush.msra.mxu1 %v2163_v15  ;;  %v3236_v14 = vld [vmem:[#allocation24_spill] sm:$0xff]  ;;  %v3237_v15 = vld [vmem:[#allocation23_spill] sm:$0xff] }
 0x11b   :  { %837 = vmatpush.msra.mxu2 %v2169_v17  ;;  %857 = vmatpush.msra.mxu3 %v2167_v16  ;;  %v3238_v16 = vld [vmem:[#allocation25_spill] sm:$0xff]  ;;  %v3239_v17 = vld [vmem:[#allocation26_spill] sm:$0xff] }
 0x11c   :  { %798 = vmatpush.msra.mxu0 %v2171_v18  ;;  %818 = vmatpush.msra.mxu1 %v2173_v19  ;;  %v3240_v18 = vld [vmem:[#allocation28_spill] sm:$0xff]  ;;  %v3241_v19 = vld [vmem:[#allocation27_spill] sm:$0xff] }
 0x11d   :  { %838 = vmatpush.msra.mxu2 %v2179_v21  ;;  %858 = vmatpush.msra.mxu3 %v2177_v20  ;;  %v3242_v20 = vld [vmem:[#allocation29_spill] sm:$0xff]  ;;  %v3243_v21 = vld [vmem:[#allocation30_spill] sm:$0xff] }
 0x11e   :  { %799 = vmatpush.msra.mxu0 %v2182_v22  ;;  %819 = vmatpush.msra.mxu1 %v2184_v23  ;;  %v3244_v22 = vld [vmem:[#allocation31_spill] sm:$0xff]  ;;  %v3245_v23 = vld [vmem:[#allocation32_spill] sm:$0xff] }
 0x11f   :  { %839 = vmatpush.msra.mxu2 %v2191_v25  ;;  %859 = vmatpush.msra.mxu3 %v2189_v24  ;;  %v3246_v24 = vld [vmem:[#allocation33_spill] sm:$0xff]  ;;  %v3247_v25 = vld [vmem:[#allocation34_spill] sm:$0xff] }
 0x120   :  { %800 = vmatpush.msra.mxu0 %v2200_v27  ;;  %820 = vmatpush.msra.mxu1 %v2202_v28  ;;  %v3248_v27 = vld [vmem:[#allocation35_spill] sm:$0xff]  ;;  %v3249_v28 = vld [vmem:[#allocation36_spill] sm:$0xff] }
 0x121   :  { %840 = vmatpush.msra.mxu2 %v2208_v30  ;;  %860 = vmatpush.msra.mxu3 %v2206_v29 }
 0x122   :  { %801 = vmatpush.msra.mxu0 %v2210_v31  ;;  %821 = vmatpush.msra.mxu1 %v2212_v32  ;;  %v3250_v31 = vld [vmem:[#allocation37_spill] sm:$0xff] }
 0x123   :  { %841 = vmatpush.msra.mxu2 %v2218_v34  ;;  %861 = vmatpush.msra.mxu3 %v2216_v33  ;;  %v3251_v33 = vld [vmem:[#allocation38_spill] sm:$0xff] }
 0x124   :  { %802 = vmatpush.msra.mxu0 %v2221_v35  ;;  %822 = vmatpush.msra.mxu1 %v2223_v36 }
 0x125   :  { %842 = vmatpush.msra.mxu2 %v2230_v38  ;;  %862 = vmatpush.msra.mxu3 %v2228_v37  ;;  %v3252_v38 = vld [vmem:[#allocation40_spill] sm:$0xff] }
 0x126   :  { %803 = vmatpush.msra.mxu0 %v2239_v40  ;;  %823 = vmatpush.msra.mxu1 %v2241_v41 }
 0x127   :  { %843 = vmatpush.msra.mxu2 %v3224_v1  ;;  %863 = vmatpush.msra.mxu3 %v3225_v2 }
 0x128   :  { %804 = vmatpush.msra.mxu0 %v3226_v3  ;;  %824 = vmatpush.msra.mxu1 %v3227_v4 }
 0x129   :  { %844 = vmatpush.msra.mxu2 %v3228_v5  ;;  %864 = vmatpush.msra.mxu3 %v3229_v6 }
 0x12a   :  { %805 = vmatpush.msra.mxu0 %v3230_v7  ;;  %825 = vmatpush.msra.mxu1 %v3231_v8 }
 0x12b   :  { %845 = vmatpush.msra.mxu2 %v3232_v9  ;;  %865 = vmatpush.msra.mxu3 %v3233_v10 }
 0x12c   :  { %806 = vmatpush.msra.mxu0 %v3234_v11  ;;  %826 = vmatpush.msra.mxu1 %v3235_v12 }
 0x12d   :  { %846 = vmatpush.msra.mxu2 %v3236_v14  ;;  %866 = vmatpush.msra.mxu3 %v3237_v15 }
 0x12e   :  { %807 = vmatpush.msra.mxu0 %v3238_v16  ;;  %827 = vmatpush.msra.mxu1 %v3239_v17 }
 0x12f   :  { %847 = vmatpush.msra.mxu2 %v3240_v18  ;;  %867 = vmatpush.msra.mxu3 %v3241_v19 }
 0x130   :  { %808 = vmatpush.msra.mxu0 %v3242_v20  ;;  %828 = vmatpush.msra.mxu1 %v3243_v21 }
 0x131   :  { %848 = vmatpush.msra.mxu2 %v3244_v22  ;;  %868 = vmatpush.msra.mxu3 %v3245_v23 }
 0x132   :  { %809 = vmatpush.msra.mxu0 %v3246_v24  ;;  %829 = vmatpush.msra.mxu1 %v3247_v25 }
 0x133   :  { %849 = vmatpush.msra.mxu2 %v3248_v27  ;;  %869 = vmatpush.msra.mxu3 %v3249_v28 }
 0x18f   :  { %v513_v29 = vpop.f32.mrf.mxu0  ;;  %v533_v30 = vpop.f32.mrf.mxu1 }
 0x190   :  { %v576_v32 = vadd.f32 %v513_v29, %v3250_v31  ;;  %v577_v34 = vadd.f32 %v533_v30, %v3251_v33  ;;  %v2624_v29 = vld [vmem:[#allocation2 + $0x1e8] sm:$0xff]  ;;  %v2627_v30 = vld [vmem:[#allocation2 + $0x1f0] sm:$0xff]  ;;  %v2630_v31 = vld [vmem:[#allocation2 + $0x1f8] sm:$0xff] }
 0x191   :  { %v2636_v33 = vld [vmem:[#allocation2 + $0x1c8] sm:$0xff] }
 0x192   :  { %v1581_v35 = vmul.f32 -1.442695, %v576_v32  ;;  %v1582_v36 = vmul.f32 -1.442695, %v577_v34  ;;  %v2633_v32 = vld [vmem:[#allocation2 + $0x1c0] sm:$0xff]  ;;  %v2639_v34 = vld [vmem:[#allocation2 + $0x1d0] sm:$0xff] }
 0x194   :  { %1631 = vpow2.f32 %v1581_v35  ;;  %v2642_v35 = vld [vmem:[#allocation2 + $0x1d8] sm:$0xff] }
 0x195   :  { %1633 = vpow2.f32 %v1582_v36  ;;  %v2645_v36 = vld [vmem:[#allocation2 + $0x1a0] sm:$0xff] }
 0x196   :  { %v573_v37 = vpop.f32.mrf.mxu3  ;;  %v553_v46 = vpop.f32.mrf.mxu2 }
 0x197   :  { %v579_v40 = vadd.f32 %v573_v37, %v3252_v38  ;;  %v578_v50 = vadd.f32 %v553_v46, %v3253_v52  ;;  %v2648_v37 = vld [vmem:[#allocation2 + $0x1a8] sm:$0xff]  ;;  %v2651_v38 = vld [vmem:[#allocation2 + $0x1b0] sm:$0xff] }
 0x198   :  { %v2672_v46 = vld [vmem:[#allocation2 + $0x168] sm:$0xff] }
 0x199   :  { %v1583_v41 = vmul.f32 -1.442695, %v579_v40  ;;  %v2654_v40 = vld [vmem:[#allocation2 + $0x1b8] sm:$0xff]  ;;  %v2684_v52 = vld [vmem:[#allocation2 + $0x148] sm:$0xff] }
 0x19a   :  { %v1632_v42 = vpop.eup %1631 }
 0x19b   :  { %v1634_v43 = vpop.eup %1633  ;;  %v583_v47 = vadd.f32 1.0, %v1632_v42  ;;  %1635 = vpow2.f32 %v1583_v41  ;;  %v2657_v41 = vld [vmem:[#allocation2 + $0x180] sm:$0xff]  ;;  %v2660_v42 = vld [vmem:[#allocation2 + $0x188] sm:$0xff] }
 0x19c   :  { %v602_v55 = vadd.f32 1.0, %v1634_v43  ;;  %v2663_v43 = vld [vmem:[#allocation2 + $0x190] sm:$0xff] }
 0x19d   :  { %1637 = vrcp.f32 %v583_v47  ;;  %v595_v51 = vand.u32 2147483648, %v583_v47  ;;  %v593_v48 = vand.u32 2147483647, %v583_v47  ;;  %vm589_vm14 = vweird.f32 %v583_v47 }
 0x19e   :  { %1639 = vrcp.f32 %v602_v55  ;;  %v614_v26 = vand.u32 2147483648, %v602_v55  ;;  %v612_v61 = vand.u32 2147483647, %v602_v55  ;;  %vm608_vm15 = vweird.f32 %v602_v55 }
 0x19f   :  { %v596_v59 = vor.u32 1.1754944e-38, %v595_v51  ;;  %vm594_vm2 = vcmp.eq.f32.partialorder %v593_v48, 8.507059e+37  ;;  %v2705_v51 = vld [vmem:[#allocation2 + $0x100] sm:$0xff]  ;;  %v2714_v48 = vld [vmem:[#allocation2 + $0x118] sm:$0xff] }
 0x1a0   :  { %v615_v2 = vor.u32 1.1754944e-38, %v614_v26  ;;  %vm613_vm3 = vcmp.eq.f32.partialorder %v612_v61, 8.507059e+37  ;;  %v2708_v26 = vld [vmem:[#allocation2 + $0x108] sm:$0xff] }
 0x1a1   :  { %v1636_v62 = vpop.eup %1635  ;;  %v2720_v61 = vld [vmem:[#allocation2 + $0xe8] sm:$0xff] }
 0x1a2   :  { %v622_v13 = vadd.f32 1.0, %v1636_v62  ;;  %v2675_v62 = vld [vmem:[#allocation2 + $0x170] sm:$0xff] }
 0x1a3   :  { %v1638_v57 = vpop.eup %1637 }
 0x1a4   :  { %v1640_v0 = vpop.eup %1639  ;;  %v585_v49 = vmul.f32 %v1638_v57, %v583_v47  ;;  %1641 = vrcp.f32 %v622_v13  ;;  %vm590_vm12 = vweird.f32 %v1638_v57  ;;  %v634_v15 = vand.u32 2147483648, %v622_v13  ;;  %v2666_v47 = vld [vmem:[#allocation2 + $0x198] sm:$0xff] }
 0x1a5   :  { %v604_v44 = vmul.f32 %v1640_v0, %v602_v55  ;;  %1643 = vtanh.f32 %v578_v50  ;;  %vm609_vm13 = vweird.f32 %v1640_v0  ;;  %vm591_vm0 = vmor %vm589_vm14, %vm590_vm12  ;;  %vm628_vm5 = vweird.f32 %v622_v13  ;;  %v2669_v55 = vld [vmem:[#allocation2 + $0x160] sm:$0xff]  ;;  %v2687_v50 = vld [vmem:[#allocation2 + $0x150] sm:$0xff] }
 0x1a6   :  { %v586_v45 = vsub.f32 1.0, %v585_v49  ;;  %vm610_vm1 = vmor %vm608_vm15, %vm609_vm13  ;;  %v632_v16 = vand.u32 2147483647, %v622_v13  ;;  %v635_v18 = vor.u32 1.1754944e-38, %v634_v15  ;;  %v2693_v49 = vld [vmem:[#allocation2 + $0x120] sm:$0xff]  ;;  %v2771_v15 = vld [vmem:[#allocation2 + $0x70] sm:$0xff] }
 0x1a7   :  { %v605_v63 = vsub.f32 1.0, %v604_v44  ;;  %v2696_v44 = vld [vmem:[#allocation2 + $0x128] sm:$0xff]  ;;  %3266 = vst [vmem:[#allocation24_spill] sm:$0xff] %v2771_v15 }
 0x1a8   :  { %v587_v53 = vmul.f32 %v1638_v57, %v586_v45  ;;  %vm633_vm7 = vcmp.eq.f32.partialorder %v632_v16, 8.507059e+37  ;;  %v2699_v45 = vld [vmem:[#allocation2 + $0x130] sm:$0xff]  ;;  %v2774_v16 = vld [vmem:[#allocation2 + $0x78] sm:$0xff] }
 0x1a9   :  { %v606_v56 = vmul.f32 %v1640_v0, %v605_v63  ;;  %v2702_v63 = vld [vmem:[#allocation2 + $0x138] sm:$0xff]  ;;  %3267 = vst [vmem:[#allocation23_spill] sm:$0xff] %v2774_v16 }
 0x1aa   :  { %v1642_v54 = vpop.eup %1641  ;;  %v588_v58 = vadd.f32 %v1638_v57, %v587_v53  ;;  %v2711_v53 = vld [vmem:[#allocation2 + $0x110] sm:$0xff] }
 0x1ab   :  { %v607_v60 = vadd.f32 %v1640_v0, %v606_v56  ;;  %v624_v1 = vmul.f32 %v1642_v54, %v622_v13  ;;  %v1644_v4 = vpop.eup %1643  ;;  %vm629_vm4 = vweird.f32 %v1642_v54  ;;  %v2678_v13 = vld [vmem:[#allocation2 + $0x178] sm:$0xff]  ;;  %v2717_v56 = vld [vmem:[#allocation2 + $0xe0] sm:$0xff] }
 0x1ac   :  { %v592_v3 = vsel %vm591_vm0, %v1638_v57, %v588_v58  ;;  %vm630_vm6 = vmor %vm628_vm5, %vm629_vm4  ;;  %v2681_v57 = vld [vmem:[#allocation2 + $0x140] sm:$0xff]  ;;  %v2726_v58 = vld [vmem:[#allocation2 + $0xf8] sm:$0xff] }
 0x1ad   :  { %v597_v5 = vsel %vm594_vm2, %v596_v59, %v592_v3  ;;  %v611_v6 = vsel %vm610_vm1, %v1640_v0, %v607_v60  ;;  %v625_v7 = vsub.f32 1.0, %v624_v1  ;;  %v2690_v0 = vld [vmem:[#allocation2 + $0x158] sm:$0xff]  ;;  %v2729_v59 = vld [vmem:[#allocation2 + $0xc0] sm:$0xff]  ;;  %v2732_v60 = vld [vmem:[#allocation2 + $0xc8] sm:$0xff] }
 0x1ae   :  { %v616_v8 = vsel %vm613_vm3, %v615_v2, %v611_v6  ;;  %v639_v9 = vmul.f32 %v1644_v4, %v597_v5  ;;  %v2735_v1 = vld [vmem:[#allocation2 + $0xd0] sm:$0xff]  ;;  %v2738_v2 = vld [vmem:[#allocation2 + $0xd8] sm:$0xff]  ;;  %v2741_v3 = vld [vmem:[#allocation2 + $0xa0] sm:$0xff] }
 0x1af   :  { %v638_v10 = vmul.f32 %v616_v8, %v2540_v39  ;;  %v626_v11 = vmul.f32 %v1642_v54, %v625_v7  ;;  %v2621_v39 = vld [vmem:[#allocation2 + $0x1e0] sm:$0xff]  ;;  %3254 = vst [vmem:[#allocation12_spill] sm:$0xff] %v2735_v1  ;;  %v2744_v4 = vld [vmem:[#allocation2 + $0xa8] sm:$0xff]  ;;  %v2747_v5 = vld [vmem:[#allocation2 + $0xb0] sm:$0xff] }
 0x1b0   :  { %3255 = vst [vmem:[#allocation11_spill] sm:$0xff] %v2738_v2  ;;  %v2750_v6 = vld [vmem:[#allocation2 + $0xb8] sm:$0xff]  ;;  %v2753_v7 = vld [vmem:[#allocation2 + $0x80] sm:$0xff]  ;;  %v2756_v8 = vld [vmem:[#allocation2 + $0x88] sm:$0xff] }
 0x1b1   :  { %v2615_v12 = vadd.f32 %v639_v9, %v638_v10  ;;  %v627_v14 = vadd.f32 %v1642_v54, %v626_v11  ;;  %3256 = vst [vmem:[#allocation13_spill] sm:$0xff] %v2741_v3  ;;  %v2759_v9 = vld [vmem:[#allocation2 + $0x90] sm:$0xff]  ;;  %v2762_v10 = vld [vmem:[#allocation2 + $0x98] sm:$0xff]  ;;  %v2765_v11 = vld [vmem:[#allocation2 + $0x60] sm:$0xff] }
 0x1b2   :  { %3257 = vst [vmem:[#allocation14_spill] sm:$0xff] %v2744_v4 }
 0x1b3   :  { %1645 = vtanh.f32 %v2615_v12  ;;  %v631_v17 = vsel %vm630_vm6, %v1642_v54, %v627_v14  ;;  %v2723_v54 = vld [vmem:[#allocation2 + $0xf0] sm:$0xff]  ;;  %3258 = vst [vmem:[#allocation16_spill] sm:$0xff] %v2747_v5  ;;  %v2768_v14 = vld [vmem:[#allocation2 + $0x68] sm:$0xff] }
 0x1b4   :  { %v636_v20 = vsel %vm633_vm7, %v635_v18, %v631_v17  ;;  %3259 = vst [vmem:[#allocation15_spill] sm:$0xff] %v2750_v6  ;;  %v2777_v17 = vld [vmem:[#allocation2 + $0x40] sm:$0xff]  ;;  %v2780_v18 = vld [vmem:[#allocation2 + $0x48] sm:$0xff] }
 0x1b5   :  { %3260 = vst [vmem:[#allocation17_spill] sm:$0xff] %v2753_v7 }
 0x1b6   :  { %3261 = vst [vmem:[#allocation18_spill] sm:$0xff] %v2756_v8 }
 0x1b7   :  { %3262 = vst [vmem:[#allocation20_spill] sm:$0xff] %v2759_v9 }
 0x1b8   :  { %3263 = vst [vmem:[#allocation19_spill] sm:$0xff] %v2762_v10 }
 0x1b9   :  { %v1646_v19 = vpop.eup %1645  ;;  %3264 = vst [vmem:[#allocation21_spill] sm:$0xff] %v2765_v11 }
 0x1ba   :  { %v642_v21 = vmul.f32 %v1646_v19, %v636_v20  ;;  %3265 = vst [vmem:[#allocation22_spill] sm:$0xff] %v2768_v14  ;;  %v2783_v19 = vld [vmem:[#allocation2 + $0x50] sm:$0xff]  ;;  %v2786_v20 = vld [vmem:[#allocation2 + $0x58] sm:$0xff] }
 0x1bb   :  { %3268 = vst [vmem:[#allocation25_spill] sm:$0xff] %v2777_v17 }
 0x1bc   :  { %1584 = vst [vmem:[%s3078_s4 + $0x8] sm:$0xff] %v642_v21  ;;  %661 = vmatmul.f32.vlgmr.msrb.gmra.mxu0 %v642_v21  ;;  %681 = vmatmul.f32.vlgmr.msrb.gmra.mxu1 %v642_v21 }
 0x1bd   :  { %701 = vmatmul.f32.vlgmr.msrb.gmra.mxu2 %v642_v21  ;;  %721 = vmatmul.f32.vlgmr.msrb.gmra.mxu3 %v642_v21  ;;  %3269 = vst [vmem:[#allocation26_spill] sm:$0xff] %v2780_v18  ;;  %v2789_v21 = vld [vmem:[#allocation2 + $0x20] sm:$0xff] }
 0x1be   :  { %943 = vmatpush.msrb.mxu0 %v2621_v39  ;;  %963 = vmatpush.msrb.mxu1 %v2624_v29  ;;  %3270 = vst [vmem:[#allocation28_spill] sm:$0xff] %v2783_v19 }
 0x1bf   :  { %983 = vmatpush.msrb.mxu2 %v2627_v30  ;;  %1003 = vmatpush.msrb.mxu3 %v2630_v31  ;;  %3271 = vst [vmem:[#allocation27_spill] sm:$0xff] %v2786_v20 }
 0x1c0   :  { %944 = vmatpush.msrb.mxu0 %v2633_v32  ;;  %964 = vmatpush.msrb.mxu1 %v2636_v33  ;;  %3272 = vst [vmem:[#allocation29_spill] sm:$0xff] %v2789_v21 }
 0x1c1   :  { %984 = vmatpush.msrb.mxu2 %v2639_v34  ;;  %1004 = vmatpush.msrb.mxu3 %v2642_v35 }
 0x1c2   :  { %945 = vmatpush.msrb.mxu0 %v2645_v36  ;;  %965 = vmatpush.msrb.mxu1 %v2648_v37 }
 0x1c3   :  { %985 = vmatpush.msrb.mxu2 %v2651_v38  ;;  %1005 = vmatpush.msrb.mxu3 %v2654_v40 }
 0x1c4   :  { %946 = vmatpush.msrb.mxu0 %v2657_v41  ;;  %966 = vmatpush.msrb.mxu1 %v2660_v42 }
 0x1c5   :  { %986 = vmatpush.msrb.mxu2 %v2663_v43  ;;  %1006 = vmatpush.msrb.mxu3 %v2666_v47 }
 0x1c6   :  { %947 = vmatpush.msrb.mxu0 %v2669_v55  ;;  %967 = vmatpush.msrb.mxu1 %v2672_v46 }
 0x1c7   :  { %987 = vmatpush.msrb.mxu2 %v2675_v62  ;;  %1007 = vmatpush.msrb.mxu3 %v2678_v13 }
 0x1c8   :  { %948 = vmatpush.msrb.mxu0 %v2681_v57  ;;  %968 = vmatpush.msrb.mxu1 %v2684_v52 }
 0x1c9   :  { %988 = vmatpush.msrb.mxu2 %v2687_v50  ;;  %1008 = vmatpush.msrb.mxu3 %v2690_v0 }
 0x1ca   :  { %949 = vmatpush.msrb.mxu0 %v2693_v49  ;;  %969 = vmatpush.msrb.mxu1 %v2696_v44 }
 0x1cb   :  { %989 = vmatpush.msrb.mxu2 %v2699_v45  ;;  %1009 = vmatpush.msrb.mxu3 %v2702_v63 }
 0x1cc   :  { %950 = vmatpush.msrb.mxu0 %v2705_v51  ;;  %970 = vmatpush.msrb.mxu1 %v2708_v26 }
 0x1cd   :  { %990 = vmatpush.msrb.mxu2 %v2711_v53  ;;  %1010 = vmatpush.msrb.mxu3 %v2714_v48 }
 0x1ce   :  { %951 = vmatpush.msrb.mxu0 %v2717_v56  ;;  %971 = vmatpush.msrb.mxu1 %v2720_v61 }
 0x1cf   :  { %991 = vmatpush.msrb.mxu2 %v2723_v54  ;;  %1011 = vmatpush.msrb.mxu3 %v2726_v58 }
 0x1d0   :  { %952 = vmatpush.msrb.mxu0 %v2729_v59  ;;  %972 = vmatpush.msrb.mxu1 %v2732_v60 }
 0x1d1   :  { %992 = vmatpush.msrb.mxu2 %v2735_v1  ;;  %1012 = vmatpush.msrb.mxu3 %v2738_v2 }
 0x1d2   :  { %953 = vmatpush.msrb.mxu0 %v2741_v3  ;;  %973 = vmatpush.msrb.mxu1 %v2744_v4 }
 0x1d3   :  { %993 = vmatpush.msrb.mxu2 %v2747_v5  ;;  %1013 = vmatpush.msrb.mxu3 %v2750_v6 }
 0x1d4   :  { %954 = vmatpush.msrb.mxu0 %v2753_v7  ;;  %974 = vmatpush.msrb.mxu1 %v2756_v8 }
 0x1d5   :  { %994 = vmatpush.msrb.mxu2 %v2759_v9  ;;  %1014 = vmatpush.msrb.mxu3 %v2762_v10 }
 0x1d6   :  { %955 = vmatpush.msrb.mxu0 %v2765_v11  ;;  %975 = vmatpush.msrb.mxu1 %v2768_v14 }
 0x1d7   :  { %995 = vmatpush.msrb.mxu2 %v2771_v15  ;;  %1015 = vmatpush.msrb.mxu3 %v2774_v16  ;;  %v2792_v16 = vld [vmem:[#allocation2 + $0x28] sm:$0xff] }
 0x1d8   :  { %956 = vmatpush.msrb.mxu0 %v2777_v17  ;;  %976 = vmatpush.msrb.mxu1 %v2780_v18  ;;  %3273 = vst [vmem:[#allocation30_spill] sm:$0xff] %v2792_v16  ;;  %v3274_v18 = vld [vmem:[#allocation41_spill] sm:$0xff]  ;;  %v3275_v17 = vld [vmem:[#allocation42_spill] sm:$0xff] }
 0x1d9   :  { %996 = vmatpush.msrb.mxu2 %v2783_v19  ;;  %1016 = vmatpush.msrb.mxu3 %v2786_v20 }
 0x1da   :  { %957 = vmatpush.msrb.mxu0 %v2789_v21  ;;  %977 = vmatpush.msrb.mxu1 %v2792_v16 }
 0x1db   :  { %997 = vmatpush.msrb.mxu2 %v3244_v22  ;;  %1017 = vmatpush.msrb.mxu3 %v3245_v23  ;;  %v3276_v23 = vld [vmem:[#allocation44_spill] sm:$0xff] }
 0x1dc   :  { %958 = vmatpush.msrb.mxu0 %v3246_v24  ;;  %978 = vmatpush.msrb.mxu1 %v3247_v25 }
 0x1dd   :  { %998 = vmatpush.msrb.mxu2 %v3248_v27  ;;  %1018 = vmatpush.msrb.mxu3 %v3249_v28 }
 0x239   :  { %v662_v20 = vpop.f32.mrf.mxu0  ;;  %v682_v19 = vpop.f32.mrf.mxu1 }
 0x23a   :  { %v725_v21 = vadd.f32 %v662_v20, %v3274_v18  ;;  %v726_v15 = vadd.f32 %v682_v19, %v3275_v17  ;;  %v3277_v17 = vld [vmem:[#allocation43_spill] sm:$0xff] }
 0x23c   :  { %v1585_v14 = vmul.f32 -1.442695, %v725_v21  ;;  %v1586_v16 = vmul.f32 -1.442695, %v726_v15 }
 0x23e   :  { %1647 = vpow2.f32 %v1585_v14 }
 0x23f   :  { %1649 = vpow2.f32 %v1586_v16 }
 0x240   :  { %v722_v22 = vpop.f32.mrf.mxu3  ;;  %v702_v28 = vpop.f32.mrf.mxu2 }
 0x241   :  { %v728_v11 = vadd.f32 %v722_v22, %v3276_v23  ;;  %v727_v19 = vadd.f32 %v702_v28, %v3277_v17 }
 0x243   :  { %v1587_v24 = vmul.f32 -1.442695, %v728_v11 }
 0x244   :  { %v1648_v10 = vpop.eup %1647 }
 0x245   :  { %v1650_v25 = vpop.eup %1649  ;;  %v732_v9 = vadd.f32 1.0, %v1648_v10  ;;  %1651 = vpow2.f32 %v1587_v24 }
 0x246   :  { %v751_v27 = vadd.f32 1.0, %v1650_v25 }
 0x247   :  { %1653 = vrcp.f32 %v732_v9  ;;  %v744_v11 = vand.u32 2147483648, %v732_v9  ;;  %v742_v24 = vand.u32 2147483647, %v732_v9  ;;  %vm738_vm10 = vweird.f32 %v732_v9 }
 0x248   :  { %1655 = vrcp.f32 %v751_v27  ;;  %v763_v23 = vand.u32 2147483648, %v751_v27  ;;  %v761_v7 = vand.u32 2147483647, %v751_v27  ;;  %vm757_vm11 = vweird.f32 %v751_v27 }
 0x249   :  { %v745_v28 = vor.u32 1.1754944e-38, %v744_v11  ;;  %vm743_vm14 = vcmp.eq.f32.partialorder %v742_v24, 8.507059e+37 }
 0x24a   :  { %vm762_vm15 = vcmp.eq.f32.partialorder %v761_v7, 8.507059e+37 }
 0x24b   :  { %v1652_v8 = vpop.eup %1651 }
 0x24c   :  { %v771_v18 = vadd.f32 1.0, %v1652_v8 }
 0x24d   :  { %v1654_v20 = vpop.eup %1653 }
 0x24e   :  { %v1656_v15 = vpop.eup %1655  ;;  %v734_v14 = vmul.f32 %v1654_v20, %v732_v9  ;;  %1657 = vrcp.f32 %v771_v18  ;;  %vm739_vm8 = vweird.f32 %v1654_v20  ;;  %v783_v11 = vand.u32 2147483648, %v771_v18 }
 0x24f   :  { %v753_v16 = vmul.f32 %v1656_v15, %v751_v27  ;;  %1659 = vtanh.f32 %v727_v19  ;;  %vm758_vm9 = vweird.f32 %v1656_v15  ;;  %vm740_vm12 = vmor %vm738_vm10, %vm739_vm8  ;;  %vm777_vm1 = vweird.f32 %v771_v18 }
 0x250   :  { %v735_v21 = vsub.f32 1.0, %v734_v14  ;;  %vm759_vm13 = vmor %vm757_vm11, %vm758_vm9  ;;  %v764_v14 = vor.u32 1.1754944e-38, %v763_v23  ;;  %v784_v24 = vor.u32 1.1754944e-38, %v783_v11  ;;  %v3296_v11 = vld [vmem:[#allocation29_spill] sm:$0xff] }
 0x251   :  { %v754_v22 = vsub.f32 1.0, %v753_v16 }
 0x252   :  { %v736_v10 = vmul.f32 %v1654_v20, %v735_v21 }
 0x253   :  { %v755_v25 = vmul.f32 %v1656_v15, %v754_v22 }
 0x254   :  { %v1658_v6 = vpop.eup %1657  ;;  %v737_v8 = vadd.f32 %v1654_v20, %v736_v10 }
 0x255   :  { %v756_v17 = vadd.f32 %v1656_v15, %v755_v25  ;;  %v773_v5 = vmul.f32 %v1658_v6, %v771_v18  ;;  %v1660_v19 = vpop.eup %1659  ;;  %vm778_vm0 = vweird.f32 %v1658_v6  ;;  %v3285_v25 = vld [vmem:[#allocation18_spill] sm:$0xff] }
 0x256   :  { %v741_v16 = vsel %vm740_vm12, %v1654_v20, %v737_v8  ;;  %v781_v20 = vand.u32 2147483647, %v771_v18  ;;  %vm779_vm2 = vmor %vm777_vm1, %vm778_vm0  ;;  %v3284_v18 = vld [vmem:[#allocation17_spill] sm:$0xff]  ;;  %v3286_v8 = vld [vmem:[#allocation20_spill] sm:$0xff] }
 0x257   :  { %v746_v4 = vsel %vm743_vm14, %v745_v28, %v741_v16  ;;  %v760_v21 = vsel %vm759_vm13, %v1656_v15, %v756_v17  ;;  %v774_v3 = vsub.f32 1.0, %v773_v5  ;;  %v3287_v28 = vld [vmem:[#allocation19_spill] sm:$0xff]  ;;  %v3288_v17 = vld [vmem:[#allocation21_spill] sm:$0xff]  ;;  %v3290_v16 = vld [vmem:[#allocation24_spill] sm:$0xff] }
 0x258   :  { %v765_v22 = vsel %vm762_vm15, %v764_v14, %v760_v21  ;;  %v788_v2 = vmul.f32 %v1660_v19, %v746_v4  ;;  %vm782_vm3 = vcmp.eq.f32.partialorder %v781_v20, 8.507059e+37  ;;  %v3282_v4 = vld [vmem:[#allocation16_spill] sm:$0xff]  ;;  %v3289_v14 = vld [vmem:[#allocation22_spill] sm:$0xff]  ;;  %v3291_v19 = vld [vmem:[#allocation23_spill] sm:$0xff] }
 0x259   :  { %v787_v1 = vmul.f32 %v765_v22, %v2615_v12  ;;  %v775_v10 = vmul.f32 %v1658_v6, %v774_v3  ;;  %v3278_v12 = vld [vmem:[#allocation12_spill] sm:$0xff]  ;;  %v3281_v3 = vld [vmem:[#allocation14_spill] sm:$0xff]  ;;  %v3292_v21 = vld [vmem:[#allocation25_spill] sm:$0xff] }
 0x25a   :  { %v3293_v22 = vld [vmem:[#allocation26_spill] sm:$0xff] }
 0x25b   :  { %v2806_v9 = vadd.f32 %v788_v2, %v787_v1  ;;  %v776_v27 = vadd.f32 %v1658_v6, %v775_v10  ;;  %v3279_v1 = vld [vmem:[#allocation11_spill] sm:$0xff]  ;;  %v3280_v2 = vld [vmem:[#allocation13_spill] sm:$0xff]  ;;  %v3294_v10 = vld [vmem:[#allocation28_spill] sm:$0xff] }
 0x25c   :  { %v3297_v20 = vld [vmem:[#allocation30_spill] sm:$0xff] }
 0x25d   :  { %1661 = vtanh.f32 %v2806_v9  ;;  %v780_v23 = vsel %vm779_vm2, %v1658_v6, %v776_v27  ;;  %v3283_v6 = vld [vmem:[#allocation15_spill] sm:$0xff] }
 0x25e   :  { %v785_v5 = vsel %vm782_vm3, %v784_v24, %v780_v23  ;;  %v3295_v27 = vld [vmem:[#allocation27_spill] sm:$0xff]  ;;  %v2873_v24 = vld [vmem:[#allocation2 + $0x38] sm:$0xff] }
 0x25f   :  { %v2870_v23 = vld [vmem:[#allocation2 + $0x30] sm:$0xff]  ;;  %3299 = vst [vmem:[#allocation32_spill] sm:$0xff] %v2873_v24 }
 0x260   :  { %3298 = vst [vmem:[#allocation31_spill] sm:$0xff] %v2870_v23 }
 0x263   :  { %v1662_v7 = vpop.eup %1661 }
 0x264   :  { %v791_v15 = vmul.f32 %v1662_v7, %v785_v5  ;;  %v2876_v7 = vld [vmem:[#allocation2] sm:$0xff]  ;;  %v2879_v5 = vld [vmem:[#allocation2 + $0x8] sm:$0xff] }
 0x265   :  { %3300 = vst [vmem:[#allocation33_spill] sm:$0xff] %v2876_v7 }
 0x266   :  { %1588 = vst [vmem:[%s3078_s4 + $0x10] sm:$0xff] %v791_v15  ;;  %810 = vmatmul.f32.vlgmr.msra.gmra.mxu0 %v791_v15  ;;  %830 = vmatmul.f32.vlgmr.msra.gmra.mxu1 %v791_v15 }
 0x267   :  { %850 = vmatmul.f32.vlgmr.msra.gmra.mxu2 %v791_v15  ;;  %870 = vmatmul.f32.vlgmr.msra.gmra.mxu3 %v791_v15  ;;  %3301 = vst [vmem:[#allocation34_spill] sm:$0xff] %v2879_v5  ;;  %v2882_v15 = vld [vmem:[#allocation2 + $0x10] sm:$0xff] }
 0x268   :  { %1092 = vmatpush.msra.mxu0 %v2621_v39  ;;  %1112 = vmatpush.msra.mxu1 %v2624_v29  ;;  %3302 = vst [vmem:[#allocation35_spill] sm:$0xff] %v2882_v15 }
 0x269   :  { %1132 = vmatpush.msra.mxu2 %v2627_v30  ;;  %1152 = vmatpush.msra.mxu3 %v2630_v31 }
 0x26a   :  { %1093 = vmatpush.msra.mxu0 %v2633_v32  ;;  %1113 = vmatpush.msra.mxu1 %v2636_v33 }
 0x26b   :  { %1133 = vmatpush.msra.mxu2 %v2639_v34  ;;  %1153 = vmatpush.msra.mxu3 %v2642_v35 }
 0x26c   :  { %1094 = vmatpush.msra.mxu0 %v2645_v36  ;;  %1114 = vmatpush.msra.mxu1 %v2648_v37 }
 0x26d   :  { %1134 = vmatpush.msra.mxu2 %v2651_v38  ;;  %1154 = vmatpush.msra.mxu3 %v2654_v40 }
 0x26e   :  { %1095 = vmatpush.msra.mxu0 %v2657_v41  ;;  %1115 = vmatpush.msra.mxu1 %v2660_v42 }
 0x26f   :  { %1135 = vmatpush.msra.mxu2 %v2663_v43  ;;  %1155 = vmatpush.msra.mxu3 %v2666_v47 }
 0x270   :  { %1096 = vmatpush.msra.mxu0 %v2669_v55  ;;  %1116 = vmatpush.msra.mxu1 %v2672_v46 }
 0x271   :  { %1136 = vmatpush.msra.mxu2 %v2675_v62  ;;  %1156 = vmatpush.msra.mxu3 %v2678_v13 }
 0x272   :  { %1097 = vmatpush.msra.mxu0 %v2681_v57  ;;  %1117 = vmatpush.msra.mxu1 %v2684_v52 }
 0x273   :  { %1137 = vmatpush.msra.mxu2 %v2687_v50  ;;  %1157 = vmatpush.msra.mxu3 %v2690_v0 }
 0x274   :  { %1098 = vmatpush.msra.mxu0 %v2693_v49  ;;  %1118 = vmatpush.msra.mxu1 %v2696_v44 }
 0x275   :  { %1138 = vmatpush.msra.mxu2 %v2699_v45  ;;  %1158 = vmatpush.msra.mxu3 %v2702_v63 }
 0x276   :  { %1099 = vmatpush.msra.mxu0 %v2705_v51  ;;  %1119 = vmatpush.msra.mxu1 %v2708_v26 }
 0x277   :  { %1139 = vmatpush.msra.mxu2 %v2711_v53  ;;  %1159 = vmatpush.msra.mxu3 %v2714_v48 }
 0x278   :  { %1100 = vmatpush.msra.mxu0 %v2717_v56  ;;  %1120 = vmatpush.msra.mxu1 %v2720_v61 }
 0x279   :  { %1140 = vmatpush.msra.mxu2 %v2723_v54  ;;  %1160 = vmatpush.msra.mxu3 %v2726_v58 }
 0x27a   :  { %1101 = vmatpush.msra.mxu0 %v2729_v59  ;;  %1121 = vmatpush.msra.mxu1 %v2732_v60 }
 0x27b   :  { %1141 = vmatpush.msra.mxu2 %v3278_v12  ;;  %1161 = vmatpush.msra.mxu3 %v3279_v1 }
 0x27c   :  { %1102 = vmatpush.msra.mxu0 %v3280_v2  ;;  %1122 = vmatpush.msra.mxu1 %v3281_v3 }
 0x27d   :  { %1142 = vmatpush.msra.mxu2 %v3282_v4  ;;  %1162 = vmatpush.msra.mxu3 %v3283_v6 }
 0x27e   :  { %1103 = vmatpush.msra.mxu0 %v3284_v18  ;;  %1123 = vmatpush.msra.mxu1 %v3285_v25 }
 0x27f   :  { %1143 = vmatpush.msra.mxu2 %v3286_v8  ;;  %1163 = vmatpush.msra.mxu3 %v3287_v28 }
 0x280   :  { %1104 = vmatpush.msra.mxu0 %v3288_v17  ;;  %1124 = vmatpush.msra.mxu1 %v3289_v14 }
 0x281   :  { %1144 = vmatpush.msra.mxu2 %v3290_v16  ;;  %1164 = vmatpush.msra.mxu3 %v3291_v19 }
 0x282   :  { %1105 = vmatpush.msra.mxu0 %v3292_v21  ;;  %1125 = vmatpush.msra.mxu1 %v3293_v22 }
 0x283   :  { %1145 = vmatpush.msra.mxu2 %v3294_v10  ;;  %1165 = vmatpush.msra.mxu3 %v3295_v27  ;;  %v3304_v27 = vld [vmem:[#allocation45_spill] sm:$0xff]  ;;  %v3305_v10 = vld [vmem:[#allocation46_spill] sm:$0xff] }
 0x284   :  { %1106 = vmatpush.msra.mxu0 %v3296_v11  ;;  %1126 = vmatpush.msra.mxu1 %v3297_v20  ;;  %v2885_v20 = vld [vmem:[#allocation2 + $0x18] sm:$0xff] }
 0x285   :  { %1146 = vmatpush.msra.mxu2 %v2870_v23  ;;  %1166 = vmatpush.msra.mxu3 %v2873_v24  ;;  %3303 = vst [vmem:[#allocation36_spill] sm:$0xff] %v2885_v20 }
 0x286   :  { %1107 = vmatpush.msra.mxu0 %v2876_v7  ;;  %1127 = vmatpush.msra.mxu1 %v2879_v5  ;;  %v3306_v5 = vld [vmem:[#allocation48_spill] sm:$0xff] }
 0x287   :  { %1147 = vmatpush.msra.mxu2 %v2882_v15  ;;  %1167 = vmatpush.msra.mxu3 %v2885_v20 }
 0x2e3   :  { %v811_v23 = vpop.f32.mrf.mxu0  ;;  %v831_v11 = vpop.f32.mrf.mxu1 }
 0x2e4   :  { %v874_v24 = vadd.f32 %v811_v23, %v3304_v27  ;;  %v875_v22 = vadd.f32 %v831_v11, %v3305_v10  ;;  %v3307_v10 = vld [vmem:[#allocation47_spill] sm:$0xff] }
 0x2e6   :  { %v1589_v21 = vmul.f32 -1.442695, %v874_v24  ;;  %v1590_v7 = vmul.f32 -1.442695, %v875_v22 }
 0x2e8   :  { %1663 = vpow2.f32 %v1589_v21 }
 0x2e9   :  { %1665 = vpow2.f32 %v1590_v7 }
 0x2ea   :  { %v871_v19 = vpop.f32.mrf.mxu3  ;;  %v851_v20 = vpop.f32.mrf.mxu2 }
 0x2eb   :  { %v877_v16 = vadd.f32 %v871_v19, %v3306_v5  ;;  %v876_v11 = vadd.f32 %v851_v20, %v3307_v10 }
 0x2ed   :  { %v1591_v14 = vmul.f32 -1.442695, %v877_v16 }
 0x2ee   :  { %v1664_v17 = vpop.eup %1663 }
 0x2ef   :  { %v1666_v15 = vpop.eup %1665  ;;  %v881_v28 = vadd.f32 1.0, %v1664_v17  ;;  %1667 = vpow2.f32 %v1591_v14 }
 0x2f0   :  { %v900_v8 = vadd.f32 1.0, %v1666_v15 }
 0x2f1   :  { %1669 = vrcp.f32 %v881_v28  ;;  %v893_v16 = vand.u32 2147483648, %v881_v28  ;;  %v891_v14 = vand.u32 2147483647, %v881_v28  ;;  %vm887_vm6 = vweird.f32 %v881_v28 }
 0x2f2   :  { %1671 = vrcp.f32 %v900_v8  ;;  %v912_v5 = vand.u32 2147483648, %v900_v8  ;;  %v910_v18 = vand.u32 2147483647, %v900_v8  ;;  %vm906_vm7 = vweird.f32 %v900_v8 }
 0x2f3   :  { %v894_v20 = vor.u32 1.1754944e-38, %v893_v16  ;;  %vm892_vm10 = vcmp.eq.f32.partialorder %v891_v14, 8.507059e+37 }
 0x2f4   :  { %vm911_vm11 = vcmp.eq.f32.partialorder %v910_v18, 8.507059e+37 }
 0x2f5   :  { %v1668_v25 = vpop.eup %1667 }
 0x2f6   :  { %v920_v27 = vadd.f32 1.0, %v1668_v25 }
 0x2f7   :  { %v1670_v23 = vpop.eup %1669 }
 0x2f8   :  { %v1672_v22 = vpop.eup %1671  ;;  %v883_v21 = vmul.f32 %v1670_v23, %v881_v28  ;;  %1673 = vrcp.f32 %v920_v27  ;;  %vm888_vm4 = vweird.f32 %v1670_v23  ;;  %v932_v16 = vand.u32 2147483648, %v920_v27 }
 0x2f9   :  { %v902_v24 = vmul.f32 %v1672_v22, %v900_v8  ;;  %1675 = vtanh.f32 %v876_v11  ;;  %vm907_vm5 = vweird.f32 %v1672_v22  ;;  %vm889_vm8 = vmor %vm887_vm6, %vm888_vm4  ;;  %vm926_vm13 = vweird.f32 %v920_v27 }
 0x2fa   :  { %v884_v7 = vsub.f32 1.0, %v883_v21  ;;  %vm908_vm9 = vmor %vm906_vm7, %vm907_vm5  ;;  %v913_v21 = vor.u32 1.1754944e-38, %v912_v5  ;;  %v933_v14 = vor.u32 1.1754944e-38, %v932_v16  ;;  %v3326_v16 = vld [vmem:[#allocation29_spill] sm:$0xff] }
 0x2fb   :  { %v903_v19 = vsub.f32 1.0, %v902_v24 }
 0x2fc   :  { %v885_v17 = vmul.f32 %v1670_v23, %v884_v7 }
 0x2fd   :  { %v904_v15 = vmul.f32 %v1672_v22, %v903_v19 }
 0x2fe   :  { %v1674_v6 = vpop.eup %1673  ;;  %v886_v25 = vadd.f32 %v1670_v23, %v885_v17 }
 0x2ff   :  { %v905_v10 = vadd.f32 %v1672_v22, %v904_v15  ;;  %v922_v4 = vmul.f32 %v1674_v6, %v920_v27  ;;  %v1676_v11 = vpop.eup %1675  ;;  %vm927_vm12 = vweird.f32 %v1674_v6  ;;  %v3315_v15 = vld [vmem:[#allocation18_spill] sm:$0xff] }
 0x300   :  { %v890_v24 = vsel %vm889_vm8, %v1670_v23, %v886_v25  ;;  %v930_v23 = vand.u32 2147483647, %v920_v27  ;;  %vm928_vm14 = vmor %vm926_vm13, %vm927_vm12  ;;  %v3314_v27 = vld [vmem:[#allocation17_spill] sm:$0xff]  ;;  %v3316_v25 = vld [vmem:[#allocation20_spill] sm:$0xff] }
 0x301   :  { %v895_v3 = vsel %vm892_vm10, %v894_v20, %v890_v24  ;;  %v909_v7 = vsel %vm908_vm9, %v1672_v22, %v905_v10  ;;  %v923_v2 = vsub.f32 1.0, %v922_v4  ;;  %v3317_v20 = vld [vmem:[#allocation19_spill] sm:$0xff]  ;;  %v3318_v10 = vld [vmem:[#allocation21_spill] sm:$0xff]  ;;  %v3320_v24 = vld [vmem:[#allocation24_spill] sm:$0xff] }
 0x302   :  { %v914_v19 = vsel %vm911_vm11, %v913_v21, %v909_v7  ;;  %v937_v1 = vmul.f32 %v1676_v11, %v895_v3  ;;  %vm931_vm15 = vcmp.eq.f32.partialorder %v930_v23, 8.507059e+37  ;;  %v3312_v3 = vld [vmem:[#allocation16_spill] sm:$0xff]  ;;  %v3319_v21 = vld [vmem:[#allocation22_spill] sm:$0xff]  ;;  %v3321_v11 = vld [vmem:[#allocation23_spill] sm:$0xff] }
 0x303   :  { %v936_v12 = vmul.f32 %v914_v19, %v2806_v9  ;;  %v924_v17 = vmul.f32 %v1674_v6, %v923_v2  ;;  %v3308_v9 = vld [vmem:[#allocation12_spill] sm:$0xff]  ;;  %v3311_v2 = vld [vmem:[#allocation14_spill] sm:$0xff]  ;;  %v3322_v7 = vld [vmem:[#allocation25_spill] sm:$0xff] }
 0x304   :  { %v3323_v19 = vld [vmem:[#allocation26_spill] sm:$0xff] }
 0x305   :  { %v2893_v28 = vadd.f32 %v937_v1, %v936_v12  ;;  %v925_v8 = vadd.f32 %v1674_v6, %v924_v17  ;;  %v3309_v12 = vld [vmem:[#allocation11_spill] sm:$0xff]  ;;  %v3310_v1 = vld [vmem:[#allocation13_spill] sm:$0xff]  ;;  %v3324_v17 = vld [vmem:[#allocation28_spill] sm:$0xff] }
 0x306   :  { %v3327_v23 = vld [vmem:[#allocation30_spill] sm:$0xff] }
 0x307   :  { %1677 = vtanh.f32 %v2893_v28  ;;  %v929_v5 = vsel %vm928_vm14, %v1674_v6, %v925_v8  ;;  %v3313_v6 = vld [vmem:[#allocation15_spill] sm:$0xff] }
 0x308   :  { %v934_v4 = vsel %vm931_vm15, %v933_v14, %v929_v5  ;;  %v3325_v8 = vld [vmem:[#allocation27_spill] sm:$0xff]  ;;  %v3329_v14 = vld [vmem:[#allocation32_spill] sm:$0xff] }
 0x309   :  { %v3328_v5 = vld [vmem:[#allocation31_spill] sm:$0xff] }
 0x30d   :  { %v1678_v18 = vpop.eup %1677 }
 0x30e   :  { %v940_v22 = vmul.f32 %v1678_v18, %v934_v4  ;;  %v3330_v18 = vld [vmem:[#allocation33_spill] sm:$0xff]  ;;  %v3331_v4 = vld [vmem:[#allocation34_spill] sm:$0xff] }
 0x310   :  { %1592 = vst [vmem:[%s3078_s4 + $0x18] sm:$0xff] %v940_v22  ;;  %959 = vmatmul.f32.vlgmr.msrb.gmra.mxu0 %v940_v22  ;;  %979 = vmatmul.f32.vlgmr.msrb.gmra.mxu1 %v940_v22 }
 0x311   :  { %999 = vmatmul.f32.vlgmr.msrb.gmra.mxu2 %v940_v22  ;;  %1019 = vmatmul.f32.vlgmr.msrb.gmra.mxu3 %v940_v22  ;;  %v3332_v22 = vld [vmem:[#allocation35_spill] sm:$0xff] }
 0x312   :  { %1241 = vmatpush.msrb.mxu0 %v2621_v39  ;;  %1261 = vmatpush.msrb.mxu1 %v2624_v29 }
 0x313   :  { %1281 = vmatpush.msrb.mxu2 %v2627_v30  ;;  %1301 = vmatpush.msrb.mxu3 %v2630_v31 }
 0x314   :  { %1242 = vmatpush.msrb.mxu0 %v2633_v32  ;;  %1262 = vmatpush.msrb.mxu1 %v2636_v33 }
 0x315   :  { %1282 = vmatpush.msrb.mxu2 %v2639_v34  ;;  %1302 = vmatpush.msrb.mxu3 %v2642_v35 }
 0x316   :  { %1243 = vmatpush.msrb.mxu0 %v2645_v36  ;;  %1263 = vmatpush.msrb.mxu1 %v2648_v37 }
 0x317   :  { %1283 = vmatpush.msrb.mxu2 %v2651_v38  ;;  %1303 = vmatpush.msrb.mxu3 %v2654_v40 }
 0x318   :  { %1244 = vmatpush.msrb.mxu0 %v2657_v41  ;;  %1264 = vmatpush.msrb.mxu1 %v2660_v42 }
 0x319   :  { %1284 = vmatpush.msrb.mxu2 %v2663_v43  ;;  %1304 = vmatpush.msrb.mxu3 %v2666_v47 }
 0x31a   :  { %1245 = vmatpush.msrb.mxu0 %v2669_v55  ;;  %1265 = vmatpush.msrb.mxu1 %v2672_v46 }
 0x31b   :  { %1285 = vmatpush.msrb.mxu2 %v2675_v62  ;;  %1305 = vmatpush.msrb.mxu3 %v2678_v13 }
 0x31c   :  { %1246 = vmatpush.msrb.mxu0 %v2681_v57  ;;  %1266 = vmatpush.msrb.mxu1 %v2684_v52 }
 0x31d   :  { %1286 = vmatpush.msrb.mxu2 %v2687_v50  ;;  %1306 = vmatpush.msrb.mxu3 %v2690_v0 }
 0x31e   :  { %1247 = vmatpush.msrb.mxu0 %v2693_v49  ;;  %1267 = vmatpush.msrb.mxu1 %v2696_v44 }
 0x31f   :  { %1287 = vmatpush.msrb.mxu2 %v2699_v45  ;;  %1307 = vmatpush.msrb.mxu3 %v2702_v63 }
 0x320   :  { %1248 = vmatpush.msrb.mxu0 %v2705_v51  ;;  %1268 = vmatpush.msrb.mxu1 %v2708_v26 }
 0x321   :  { %1288 = vmatpush.msrb.mxu2 %v2711_v53  ;;  %1308 = vmatpush.msrb.mxu3 %v2714_v48 }
 0x322   :  { %1249 = vmatpush.msrb.mxu0 %v2717_v56  ;;  %1269 = vmatpush.msrb.mxu1 %v2720_v61 }
 0x323   :  { %1289 = vmatpush.msrb.mxu2 %v2723_v54  ;;  %1309 = vmatpush.msrb.mxu3 %v2726_v58 }
 0x324   :  { %1250 = vmatpush.msrb.mxu0 %v2729_v59  ;;  %1270 = vmatpush.msrb.mxu1 %v2732_v60 }
 0x325   :  { %1290 = vmatpush.msrb.mxu2 %v3308_v9  ;;  %1310 = vmatpush.msrb.mxu3 %v3309_v12 }
 0x326   :  { %1251 = vmatpush.msrb.mxu0 %v3310_v1  ;;  %1271 = vmatpush.msrb.mxu1 %v3311_v2 }
 0x327   :  { %1291 = vmatpush.msrb.mxu2 %v3312_v3  ;;  %1311 = vmatpush.msrb.mxu3 %v3313_v6 }
 0x328   :  { %1252 = vmatpush.msrb.mxu0 %v3314_v27  ;;  %1272 = vmatpush.msrb.mxu1 %v3315_v15 }
 0x329   :  { %1292 = vmatpush.msrb.mxu2 %v3316_v25  ;;  %1312 = vmatpush.msrb.mxu3 %v3317_v20 }
 0x32a   :  { %1253 = vmatpush.msrb.mxu0 %v3318_v10  ;;  %1273 = vmatpush.msrb.mxu1 %v3319_v21 }
 0x32b   :  { %1293 = vmatpush.msrb.mxu2 %v3320_v24  ;;  %1313 = vmatpush.msrb.mxu3 %v3321_v11  ;;  %v3334_v11 = vld [vmem:[#allocation49_spill] sm:$0xff]  ;;  %v3335_v24 = vld [vmem:[#allocation50_spill] sm:$0xff] }
 0x32c   :  { %1254 = vmatpush.msrb.mxu0 %v3322_v7  ;;  %1274 = vmatpush.msrb.mxu1 %v3323_v19  ;;  %v3333_v7 = vld [vmem:[#allocation36_spill] sm:$0xff] }
 0x32d   :  { %1294 = vmatpush.msrb.mxu2 %v3324_v17  ;;  %1314 = vmatpush.msrb.mxu3 %v3325_v8 }
 0x32e   :  { %1255 = vmatpush.msrb.mxu0 %v3326_v16  ;;  %1275 = vmatpush.msrb.mxu1 %v3327_v23 }
 0x32f   :  { %1295 = vmatpush.msrb.mxu2 %v3328_v5  ;;  %1315 = vmatpush.msrb.mxu3 %v3329_v14  ;;  %v3336_v14 = vld [vmem:[#allocation52_spill] sm:$0xff] }
 0x330   :  { %1256 = vmatpush.msrb.mxu0 %v3330_v18  ;;  %1276 = vmatpush.msrb.mxu1 %v3331_v4 }
 0x331   :  { %1296 = vmatpush.msrb.mxu2 %v3332_v22  ;;  %1316 = vmatpush.msrb.mxu3 %v3333_v7 }
 0x38d   :  { %v960_v19 = vpop.f32.mrf.mxu0  ;;  %v980_v17 = vpop.f32.mrf.mxu1 }
 0x38e   :  { %v1023_v8 = vadd.f32 %v960_v19, %v3334_v11  ;;  %v1024_v16 = vadd.f32 %v980_v17, %v3335_v24  ;;  %v3337_v24 = vld [vmem:[#allocation51_spill] sm:$0xff] }
 0x390   :  { %v1593_v21 = vmul.f32 -1.442695, %v1023_v8  ;;  %v1594_v23 = vmul.f32 -1.442695, %v1024_v16 }
 0x392   :  { %1679 = vpow2.f32 %v1593_v21 }
 0x393   :  { %1681 = vpow2.f32 %v1594_v23 }
 0x394   :  { %v1020_v5 = vpop.f32.mrf.mxu3  ;;  %v1000_v7 = vpop.f32.mrf.mxu2 }
 0x395   :  { %v1026_v10 = vadd.f32 %v1020_v5, %v3336_v14  ;;  %v1025_v17 = vadd.f32 %v1000_v7, %v3337_v24 }
 0x397   :  { %v1595_v18 = vmul.f32 -1.442695, %v1026_v10 }
 0x398   :  { %v1680_v20 = vpop.eup %1679 }
 0x399   :  { %v1682_v4 = vpop.eup %1681  ;;  %v1030_v25 = vadd.f32 1.0, %v1680_v20  ;;  %1683 = vpow2.f32 %v1595_v18 }
 0x39a   :  { %v1049_v22 = vadd.f32 1.0, %v1682_v4 }
 0x39b   :  { %1685 = vrcp.f32 %v1030_v25  ;;  %v1042_v10 = vand.u32 2147483648, %v1030_v25  ;;  %v1040_v18 = vand.u32 2147483647, %v1030_v25  ;;  %vm1036_vm2 = vweird.f32 %v1030_v25 }
 0x39c   :  { %1687 = vrcp.f32 %v1049_v22  ;;  %v1061_v14 = vand.u32 2147483648, %v1049_v22  ;;  %v1059_v27 = vand.u32 2147483647, %v1049_v22  ;;  %vm1055_vm3 = vweird.f32 %v1049_v22 }
 0x39d   :  { %v1043_v7 = vor.u32 1.1754944e-38, %v1042_v10  ;;  %vm1041_vm6 = vcmp.eq.f32.partialorder %v1040_v18, 8.507059e+37 }
 0x39e   :  { %vm1060_vm7 = vcmp.eq.f32.partialorder %v1059_v27, 8.507059e+37 }
 0x39f   :  { %v1684_v15 = vpop.eup %1683 }
 0x3a0   :  { %v1069_v11 = vadd.f32 1.0, %v1684_v15 }
 0x3a1   :  { %v1686_v19 = vpop.eup %1685 }
 0x3a2   :  { %v1688_v8 = vpop.eup %1687  ;;  %v1032_v21 = vmul.f32 %v1686_v19, %v1030_v25  ;;  %1689 = vrcp.f32 %v1069_v11  ;;  %vm1037_vm0 = vweird.f32 %v1686_v19  ;;  %v1081_v10 = vand.u32 2147483648, %v1069_v11 }
 0x3a3   :  { %v1051_v16 = vmul.f32 %v1688_v8, %v1049_v22  ;;  %1691 = vtanh.f32 %v1025_v17  ;;  %vm1056_vm1 = vweird.f32 %v1688_v8  ;;  %vm1038_vm4 = vmor %vm1036_vm2, %vm1037_vm0  ;;  %vm1075_vm9 = vweird.f32 %v1069_v11 }
 0x3a4   :  { %v1033_v23 = vsub.f32 1.0, %v1032_v21  ;;  %vm1057_vm5 = vmor %vm1055_vm3, %vm1056_vm1  ;;  %v1062_v21 = vor.u32 1.1754944e-38, %v1061_v14  ;;  %v1082_v18 = vor.u32 1.1754944e-38, %v1081_v10 }
 0x3a5   :  { %v1052_v5 = vsub.f32 1.0, %v1051_v16 }
 0x3a6   :  { %v1034_v20 = vmul.f32 %v1686_v19, %v1033_v23 }
 0x3a7   :  { %v1053_v4 = vmul.f32 %v1688_v8, %v1052_v5 }
 0x3a8   :  { %v1690_v6 = vpop.eup %1689  ;;  %v1035_v15 = vadd.f32 %v1686_v19, %v1034_v20 }
 0x3a9   :  { %v1054_v24 = vadd.f32 %v1688_v8, %v1053_v4  ;;  %v1071_v3 = vmul.f32 %v1690_v6, %v1069_v11  ;;  %v1692_v17 = vpop.eup %1691  ;;  %vm1076_vm8 = vweird.f32 %v1690_v6 }
 0x3aa   :  { %v1039_v16 = vsel %vm1038_vm4, %v1686_v19, %v1035_v15  ;;  %v1079_v19 = vand.u32 2147483647, %v1069_v11  ;;  %vm1077_vm10 = vmor %vm1075_vm9, %vm1076_vm8  ;;  %v3367_v15 = vld [vmem:[#allocation55_spill] sm:$0xff] }
 0x3ab   :  { %v1044_v2 = vsel %vm1041_vm6, %v1043_v7, %v1039_v16  ;;  %v1058_v23 = vsel %vm1057_vm5, %v1688_v8, %v1054_v24  ;;  %v1072_v1 = vsub.f32 1.0, %v1071_v3 }
 0x3ac   :  { %v1063_v5 = vsel %vm1060_vm7, %v1062_v21, %v1058_v23  ;;  %v1086_v12 = vmul.f32 %v1692_v17, %v1044_v2  ;;  %vm1080_vm11 = vcmp.eq.f32.partialorder %v1079_v19, 8.507059e+37 }
 0x3ad   :  { %v1085_v9 = vmul.f32 %v1063_v5, %v2893_v28  ;;  %v1073_v20 = vmul.f32 %v1690_v6, %v1072_v1 }
 0x3af   :  { %v2968_v25 = vadd.f32 %v1086_v12, %v1085_v9  ;;  %v1074_v22 = vadd.f32 %v1690_v6, %v1073_v20 }
 0x3b1   :  { %1693 = vtanh.f32 %v2968_v25  ;;  %v1078_v14 = vsel %vm1077_vm10, %v1690_v6, %v1074_v22 }
 0x3b2   :  { %v1083_v3 = vsel %vm1080_vm11, %v1082_v18, %v1078_v14 }
 0x3b7   :  { %v1694_v27 = vpop.eup %1693 }
 0x3b8   :  { %v1089_v8 = vmul.f32 %v1694_v27, %v1083_v3 }
 0x3ba   :  { %1596 = vst [vmem:[%s3078_s4 + $0x20] sm:$0xff] %v1089_v8  ;;  %1108 = vmatmul.f32.vlgmr.msra.gmra.mxu0 %v1089_v8  ;;  %1128 = vmatmul.f32.vlgmr.msra.gmra.mxu1 %v1089_v8 }
 0x3bb   :  { %1148 = vmatmul.f32.vlgmr.msra.gmra.mxu2 %v1089_v8  ;;  %1168 = vmatmul.f32.vlgmr.msra.gmra.mxu3 %v1089_v8 }
 0x3bc   :  { %1390 = vmatpush.msra.mxu0 %v2621_v39  ;;  %1410 = vmatpush.msra.mxu1 %v2624_v29  ;;  %v3338_v39 = vld [vmem:[#allocation12_spill] sm:$0xff]  ;;  %v3339_v29 = vld [vmem:[#allocation11_spill] sm:$0xff] }
 0x3bd   :  { %1430 = vmatpush.msra.mxu2 %v2627_v30  ;;  %1450 = vmatpush.msra.mxu3 %v2630_v31  ;;  %v3340_v30 = vld [vmem:[#allocation13_spill] sm:$0xff]  ;;  %v3341_v31 = vld [vmem:[#allocation14_spill] sm:$0xff] }
 0x3be   :  { %1391 = vmatpush.msra.mxu0 %v2633_v32  ;;  %1411 = vmatpush.msra.mxu1 %v2636_v33  ;;  %v3342_v32 = vld [vmem:[#allocation16_spill] sm:$0xff]  ;;  %v3343_v33 = vld [vmem:[#allocation15_spill] sm:$0xff] }
 0x3bf   :  { %1431 = vmatpush.msra.mxu2 %v2639_v34  ;;  %1451 = vmatpush.msra.mxu3 %v2642_v35  ;;  %v3344_v34 = vld [vmem:[#allocation17_spill] sm:$0xff]  ;;  %v3345_v35 = vld [vmem:[#allocation18_spill] sm:$0xff] }
 0x3c0   :  { %1392 = vmatpush.msra.mxu0 %v2645_v36  ;;  %1412 = vmatpush.msra.mxu1 %v2648_v37  ;;  %v3346_v36 = vld [vmem:[#allocation20_spill] sm:$0xff]  ;;  %v3347_v37 = vld [vmem:[#allocation19_spill] sm:$0xff] }
 0x3c1   :  { %1432 = vmatpush.msra.mxu2 %v2651_v38  ;;  %1452 = vmatpush.msra.mxu3 %v2654_v40  ;;  %v3348_v38 = vld [vmem:[#allocation21_spill] sm:$0xff]  ;;  %v3349_v40 = vld [vmem:[#allocation22_spill] sm:$0xff] }
 0x3c2   :  { %1393 = vmatpush.msra.mxu0 %v2657_v41  ;;  %1413 = vmatpush.msra.mxu1 %v2660_v42  ;;  %v3350_v41 = vld [vmem:[#allocation24_spill] sm:$0xff]  ;;  %v3351_v42 = vld [vmem:[#allocation23_spill] sm:$0xff] }
 0x3c3   :  { %1433 = vmatpush.msra.mxu2 %v2663_v43  ;;  %1453 = vmatpush.msra.mxu3 %v2666_v47  ;;  %v3352_v43 = vld [vmem:[#allocation25_spill] sm:$0xff]  ;;  %v3353_v47 = vld [vmem:[#allocation26_spill] sm:$0xff] }
 0x3c4   :  { %1394 = vmatpush.msra.mxu0 %v2669_v55  ;;  %1414 = vmatpush.msra.mxu1 %v2672_v46  ;;  %v3354_v55 = vld [vmem:[#allocation28_spill] sm:$0xff]  ;;  %v3355_v46 = vld [vmem:[#allocation27_spill] sm:$0xff] }
 0x3c5   :  { %1434 = vmatpush.msra.mxu2 %v2675_v62  ;;  %1454 = vmatpush.msra.mxu3 %v2678_v13  ;;  %v3356_v62 = vld [vmem:[#allocation29_spill] sm:$0xff]  ;;  %v3357_v13 = vld [vmem:[#allocation30_spill] sm:$0xff] }
 0x3c6   :  { %1395 = vmatpush.msra.mxu0 %v2681_v57  ;;  %1415 = vmatpush.msra.mxu1 %v2684_v52  ;;  %v3358_v57 = vld [vmem:[#allocation31_spill] sm:$0xff]  ;;  %v3359_v52 = vld [vmem:[#allocation32_spill] sm:$0xff] }
 0x3c7   :  { %1435 = vmatpush.msra.mxu2 %v2687_v50  ;;  %1455 = vmatpush.msra.mxu3 %v2690_v0  ;;  %v3360_v50 = vld [vmem:[#allocation33_spill] sm:$0xff]  ;;  %v3361_v0 = vld [vmem:[#allocation34_spill] sm:$0xff] }
 0x3c8   :  { %1396 = vmatpush.msra.mxu0 %v2693_v49  ;;  %1416 = vmatpush.msra.mxu1 %v2696_v44  ;;  %v3362_v49 = vld [vmem:[#allocation35_spill] sm:$0xff]  ;;  %v3363_v44 = vld [vmem:[#allocation36_spill] sm:$0xff] }
 0x3c9   :  { %1436 = vmatpush.msra.mxu2 %v2699_v45  ;;  %1456 = vmatpush.msra.mxu3 %v2702_v63 }
 0x3ca   :  { %1397 = vmatpush.msra.mxu0 %v2705_v51  ;;  %1417 = vmatpush.msra.mxu1 %v2708_v26  ;;  %v3364_v51 = vld [vmem:[#allocation53_spill] sm:$0xff] }
 0x3cb   :  { %1437 = vmatpush.msra.mxu2 %v2711_v53  ;;  %1457 = vmatpush.msra.mxu3 %v2714_v48  ;;  %v3365_v53 = vld [vmem:[#allocation54_spill] sm:$0xff] }
 0x3cc   :  { %1398 = vmatpush.msra.mxu0 %v2717_v56  ;;  %1418 = vmatpush.msra.mxu1 %v2720_v61 }
 0x3cd   :  { %1438 = vmatpush.msra.mxu2 %v2723_v54  ;;  %1458 = vmatpush.msra.mxu3 %v2726_v58  ;;  %v3366_v58 = vld [vmem:[#allocation56_spill] sm:$0xff] }
 0x3ce   :  { %1399 = vmatpush.msra.mxu0 %v2729_v59  ;;  %1419 = vmatpush.msra.mxu1 %v2732_v60 }
 0x3cf   :  { %1439 = vmatpush.msra.mxu2 %v3338_v39  ;;  %1459 = vmatpush.msra.mxu3 %v3339_v29 }
 0x3d0   :  { %1400 = vmatpush.msra.mxu0 %v3340_v30  ;;  %1420 = vmatpush.msra.mxu1 %v3341_v31 }
 0x3d1   :  { %1440 = vmatpush.msra.mxu2 %v3342_v32  ;;  %1460 = vmatpush.msra.mxu3 %v3343_v33 }
 0x3d2   :  { %1401 = vmatpush.msra.mxu0 %v3344_v34  ;;  %1421 = vmatpush.msra.mxu1 %v3345_v35 }
 0x3d3   :  { %1441 = vmatpush.msra.mxu2 %v3346_v36  ;;  %1461 = vmatpush.msra.mxu3 %v3347_v37 }
 0x3d4   :  { %1402 = vmatpush.msra.mxu0 %v3348_v38  ;;  %1422 = vmatpush.msra.mxu1 %v3349_v40 }
 0x3d5   :  { %1442 = vmatpush.msra.mxu2 %v3350_v41  ;;  %1462 = vmatpush.msra.mxu3 %v3351_v42 }
 0x3d6   :  { %1403 = vmatpush.msra.mxu0 %v3352_v43  ;;  %1423 = vmatpush.msra.mxu1 %v3353_v47 }
 0x3d7   :  { %1443 = vmatpush.msra.mxu2 %v3354_v55  ;;  %1463 = vmatpush.msra.mxu3 %v3355_v46 }
 0x3d8   :  { %1404 = vmatpush.msra.mxu0 %v3356_v62  ;;  %1424 = vmatpush.msra.mxu1 %v3357_v13 }
 0x3d9   :  { %1444 = vmatpush.msra.mxu2 %v3358_v57  ;;  %1464 = vmatpush.msra.mxu3 %v3359_v52  ;;  %v3368_v52 = vld [vmem:[#allocation57_spill] sm:$0xff] }
 0x3da   :  { %1405 = vmatpush.msra.mxu0 %v3360_v50  ;;  %1425 = vmatpush.msra.mxu1 %v3361_v0  ;;  %v3369_v0 = vld [vmem:[#allocation58_spill] sm:$0xff] }
 0x3db   :  { %1445 = vmatpush.msra.mxu2 %v3362_v49  ;;  %1465 = vmatpush.msra.mxu3 %v3363_v44 }
 0x437   :  { %v1109_v45 = vpop.f32.mrf.mxu0  ;;  %v1129_v63 = vpop.f32.mrf.mxu1 }
 0x438   :  { %v1172_v26 = vadd.f32 %v1109_v45, %v3364_v51  ;;  %v1173_v48 = vadd.f32 %v1129_v63, %v3365_v53  ;;  %v3370_v51 = vld [vmem:[#allocation60_spill] sm:$0xff] }
 0x43a   :  { %v1597_v56 = vmul.f32 -1.442695, %v1172_v26  ;;  %v1598_v61 = vmul.f32 -1.442695, %v1173_v48 }
 0x43c   :  { %1695 = vpow2.f32 %v1597_v56 }
 0x43d   :  { %1697 = vpow2.f32 %v1598_v61 }
 0x43e   :  { %v1169_v54 = vpop.f32.mrf.mxu3  ;;  %v1149_v2 = vpop.f32.mrf.mxu2 }
 0x43f   :  { %v1175_v59 = vadd.f32 %v1169_v54, %v3366_v58  ;;  %v1174_v7 = vadd.f32 %v1149_v2, %v3367_v15 }
 0x441   :  { %v1599_v60 = vmul.f32 -1.442695, %v1175_v59 }
 0x442   :  { %v1696_v28 = vpop.eup %1695 }
 0x443   :  { %v1698_v9 = vpop.eup %1697  ;;  %v1179_v12 = vadd.f32 1.0, %v1696_v28  ;;  %1699 = vpow2.f32 %v1599_v60 }
 0x444   :  { %v1198_v1 = vadd.f32 1.0, %v1698_v9  ;;  %v3371_v9 = vld [vmem:[#allocation59_spill] sm:$0xff] }
 0x445   :  { %1701 = vrcp.f32 %v1179_v12  ;;  %v1191_v5 = vand.u32 2147483648, %v1179_v12  ;;  %v1189_v10 = vand.u32 2147483647, %v1179_v12  ;;  %vm1185_vm14 = vweird.f32 %v1179_v12 }
 0x446   :  { %1703 = vrcp.f32 %v1198_v1  ;;  %v1210_v20 = vand.u32 2147483648, %v1198_v1  ;;  %v1208_v14 = vand.u32 2147483647, %v1198_v1  ;;  %vm1204_vm15 = vweird.f32 %v1198_v1 }
 0x447   :  { %v1192_v3 = vor.u32 1.1754944e-38, %v1191_v5  ;;  %vm1190_vm2 = vcmp.eq.f32.partialorder %v1189_v10, 8.507059e+37 }
 0x448   :  { %v1211_v29 = vor.u32 1.1754944e-38, %v1210_v20  ;;  %vm1209_vm3 = vcmp.eq.f32.partialorder %v1208_v14, 8.507059e+37 }
 0x449   :  { %v1700_v6 = vpop.eup %1699 }
 0x44a   :  { %v1218_v11 = vadd.f32 1.0, %v1700_v6 }
 0x44b   :  { %v1702_v4 = vpop.eup %1701 }
 0x44c   :  { %v1704_v24 = vpop.eup %1703  ;;  %v1181_v21 = vmul.f32 %v1702_v4, %v1179_v12  ;;  %1705 = vrcp.f32 %v1218_v11  ;;  %vm1186_vm12 = vweird.f32 %v1702_v4  ;;  %v1230_v42 = vand.u32 2147483648, %v1218_v11 }
 0x44d   :  { %v1200_v16 = vmul.f32 %v1704_v24, %v1198_v1  ;;  %1707 = vtanh.f32 %v1174_v7  ;;  %vm1205_vm13 = vweird.f32 %v1704_v24  ;;  %vm1187_vm0 = vmor %vm1185_vm14, %vm1186_vm12  ;;  %vm1224_vm5 = vweird.f32 %v1218_v11 }
 0x44e   :  { %v1182_v17 = vsub.f32 1.0, %v1181_v21  ;;  %vm1206_vm1 = vmor %vm1204_vm15, %vm1205_vm13  ;;  %v1228_v43 = vand.u32 2147483647, %v1218_v11  ;;  %v1231_v55 = vor.u32 1.1754944e-38, %v1230_v42 }
 0x44f   :  { %v1201_v23 = vsub.f32 1.0, %v1200_v16 }
 0x450   :  { %v1183_v22 = vmul.f32 %v1702_v4, %v1182_v17  ;;  %vm1229_vm7 = vcmp.eq.f32.partialorder %v1228_v43, 8.507059e+37 }
 0x451   :  { %v1202_v19 = vmul.f32 %v1704_v24, %v1201_v23 }
 0x452   :  { %v1706_v18 = vpop.eup %1705  ;;  %v1184_v27 = vadd.f32 %v1702_v4, %v1183_v22 }
 0x453   :  { %v1203_v8 = vadd.f32 %v1704_v24, %v1202_v19  ;;  %v1220_v39 = vmul.f32 %v1706_v18, %v1218_v11  ;;  %v1708_v31 = vpop.eup %1707  ;;  %vm1225_vm4 = vweird.f32 %v1706_v18 }
 0x454   :  { %v1188_v30 = vsel %vm1187_vm0, %v1702_v4, %v1184_v27  ;;  %vm1226_vm6 = vmor %vm1224_vm5, %vm1225_vm4 }
 0x455   :  { %v1193_v32 = vsel %vm1190_vm2, %v1192_v3, %v1188_v30  ;;  %v1207_v33 = vsel %vm1206_vm1, %v1704_v24, %v1203_v8  ;;  %v1221_v34 = vsub.f32 1.0, %v1220_v39 }
 0x456   :  { %v1212_v35 = vsel %vm1209_vm3, %v1211_v29, %v1207_v33  ;;  %v1235_v36 = vmul.f32 %v1708_v31, %v1193_v32 }
 0x457   :  { %v1234_v37 = vmul.f32 %v1212_v35, %v2968_v25  ;;  %v1222_v38 = vmul.f32 %v1706_v18, %v1221_v34 }
 0x459   :  { %v3043_v40 = vadd.f32 %v1235_v36, %v1234_v37  ;;  %v1223_v41 = vadd.f32 %v1706_v18, %v1222_v38 }
 0x45b   :  { %1709 = vtanh.f32 %v3043_v40  ;;  %v1227_v47 = vsel %vm1226_vm6, %v1706_v18, %v1223_v41 }
 0x45c   :  { %v1232_v62 = vsel %vm1229_vm7, %v1231_v55, %v1227_v47  ;;  %v3372_v47 = vld [vmem:[#allocation61_spill] sm:$0xff] }
 0x461   :  { %v1710_v46 = vpop.eup %1709 }
 0x462   :  { %v1238_v13 = vmul.f32 %v1710_v46, %v1232_v62  ;;  %v3373_v46 = vld [vmem:[#allocation62_spill] sm:$0xff] }
 0x464   :  { %1600 = vst [vmem:[%s3078_s4 + $0x28] sm:$0xff] %v1238_v13  ;;  %1257 = vmatmul.f32.vlgmr.msrb.gmra.mxu0 %v1238_v13  ;;  %1277 = vmatmul.f32.vlgmr.msrb.gmra.mxu1 %v1238_v13 }
 0x465   :  { %1297 = vmatmul.f32.vlgmr.msrb.gmra.mxu2 %v1238_v13  ;;  %1317 = vmatmul.f32.vlgmr.msrb.gmra.mxu3 %v1238_v13 }
 0x4e1   :  { %v1258_v25 = vpop.f32.mrf.mxu0  ;;  %v1278_v57 = vpop.f32.mrf.mxu1 }
 0x4e2   :  { %v1321_v50 = vadd.f32 %v1258_v25, %v3368_v52  ;;  %v1322_v49 = vadd.f32 %v1278_v57, %v3369_v0  ;;  %v3374_v52 = vld [vmem:[#allocation64_spill] sm:$0xff] }
 0x4e4   :  { %v1601_v44 = vmul.f32 -1.442695, %v1321_v50  ;;  %v1602_v45 = vmul.f32 -1.442695, %v1322_v49 }
 0x4e6   :  { %1711 = vpow2.f32 %v1601_v44 }
 0x4e7   :  { %1713 = vpow2.f32 %v1602_v45 }
 0x4e8   :  { %v1318_v63 = vpop.f32.mrf.mxu3  ;;  %v1298_v58 = vpop.f32.mrf.mxu2 }
 0x4e9   :  { %v1324_v26 = vadd.f32 %v1318_v63, %v3370_v51  ;;  %v1323_v12 = vadd.f32 %v1298_v58, %v3371_v9 }
 0x4eb   :  { %v1603_v53 = vmul.f32 -1.442695, %v1324_v26 }
 0x4ec   :  { %v1712_v48 = vpop.eup %1711 }
 0x4ed   :  { %v1714_v56 = vpop.eup %1713  ;;  %v1328_v61 = vadd.f32 1.0, %v1712_v48  ;;  %1715 = vpow2.f32 %v1603_v53 }
 0x4ee   :  { %v1347_v54 = vadd.f32 1.0, %v1714_v56  ;;  %v3375_v56 = vld [vmem:[#allocation63_spill] sm:$0xff] }
 0x4ef   :  { %1717 = vrcp.f32 %v1328_v61  ;;  %v1340_v15 = vand.u32 2147483648, %v1328_v61  ;;  %v1338_v21 = vand.u32 2147483647, %v1328_v61  ;;  %vm1334_vm10 = vweird.f32 %v1328_v61 }
 0x4f0   :  { %1719 = vrcp.f32 %v1347_v54  ;;  %v1359_v7 = vand.u32 2147483648, %v1347_v54  ;;  %v1357_v17 = vand.u32 2147483647, %v1347_v54  ;;  %vm1353_vm11 = vweird.f32 %v1347_v54 }
 0x4f1   :  { %v1341_v20 = vor.u32 1.1754944e-38, %v1340_v15  ;;  %vm1339_vm14 = vcmp.eq.f32.partialorder %v1338_v21, 8.507059e+37 }
 0x4f2   :  { %v1360_v19 = vor.u32 1.1754944e-38, %v1359_v7  ;;  %vm1358_vm15 = vcmp.eq.f32.partialorder %v1357_v17, 8.507059e+37 }
 0x4f3   :  { %v1716_v59 = vpop.eup %1715 }
 0x4f4   :  { %v1367_v60 = vadd.f32 1.0, %v1716_v59 }
 0x4f5   :  { %v1718_v28 = vpop.eup %1717 }
 0x4f6   :  { %v1720_v1 = vpop.eup %1719  ;;  %v1330_v2 = vmul.f32 %v1718_v28, %v1328_v61  ;;  %1721 = vrcp.f32 %v1367_v60  ;;  %vm1335_vm8 = vweird.f32 %v1718_v28  ;;  %v1379_v34 = vand.u32 2147483648, %v1367_v60 }
 0x4f7   :  { %v1349_v6 = vmul.f32 %v1720_v1, %v1347_v54  ;;  %1723 = vtanh.f32 %v1323_v12  ;;  %vm1354_vm9 = vweird.f32 %v1720_v1  ;;  %vm1336_vm12 = vmor %vm1334_vm10, %vm1335_vm8  ;;  %vm1373_vm1 = vweird.f32 %v1367_v60 }
 0x4f8   :  { %v1331_v11 = vsub.f32 1.0, %v1330_v2  ;;  %vm1355_vm13 = vmor %vm1353_vm11, %vm1354_vm9  ;;  %v1377_v35 = vand.u32 2147483647, %v1367_v60  ;;  %v1380_v37 = vor.u32 1.1754944e-38, %v1379_v34 }
 0x4f9   :  { %v1350_v4 = vsub.f32 1.0, %v1349_v6 }
 0x4fa   :  { %v1332_v24 = vmul.f32 %v1718_v28, %v1331_v11  ;;  %vm1378_vm3 = vcmp.eq.f32.partialorder %v1377_v35, 8.507059e+37 }
 0x4fb   :  { %v1351_v16 = vmul.f32 %v1720_v1, %v1350_v4 }
 0x4fc   :  { %v1722_v23 = vpop.eup %1721  ;;  %v1333_v5 = vadd.f32 %v1718_v28, %v1332_v24 }
 0x4fd   :  { %v1352_v22 = vadd.f32 %v1720_v1, %v1351_v16  ;;  %v1369_v10 = vmul.f32 %v1722_v23, %v1367_v60  ;;  %v1724_v18 = vpop.eup %1723  ;;  %vm1374_vm0 = vweird.f32 %v1722_v23 }
 0x4fe   :  { %v1337_v14 = vsel %vm1336_vm12, %v1718_v28, %v1333_v5  ;;  %vm1375_vm2 = vmor %vm1373_vm1, %vm1374_vm0 }
 0x4ff   :  { %v1342_v27 = vsel %vm1339_vm14, %v1341_v20, %v1337_v14  ;;  %v1356_v3 = vsel %vm1355_vm13, %v1720_v1, %v1352_v22  ;;  %v1370_v8 = vsub.f32 1.0, %v1369_v10 }
 0x500   :  { %v1361_v39 = vsel %vm1358_vm15, %v1360_v19, %v1356_v3  ;;  %v1384_v29 = vmul.f32 %v1724_v18, %v1342_v27 }
 0x501   :  { %v1383_v30 = vmul.f32 %v1361_v39, %v3043_v40  ;;  %v1371_v31 = vmul.f32 %v1722_v23, %v1370_v8 }
 0x503   :  { %v3054_v32 = vadd.f32 %v1384_v29, %v1383_v30  ;;  %v1372_v33 = vadd.f32 %v1722_v23, %v1371_v31 }
 0x505   :  { %1725 = vtanh.f32 %v3054_v32  ;;  %v1376_v36 = vsel %vm1375_vm2, %v1722_v23, %v1372_v33 }
 0x506   :  { %v1381_v41 = vsel %vm1378_vm3, %v1380_v37, %v1376_v36 }
 0x50b   :  { %v1726_v38 = vpop.eup %1725 }
 0x50c   :  { %v1387_v42 = vmul.f32 %v1726_v38, %v1381_v41 }
 0x50e   :  { %1604 = vst [vmem:[%s3078_s4 + $0x30] sm:$0xff] %v1387_v42  ;;  %1406 = vmatmul.f32.vlgmr.msra.gmra.mxu0 %v1387_v42  ;;  %1426 = vmatmul.f32.vlgmr.msra.gmra.mxu1 %v1387_v42 }
 0x50f   :  { %1446 = vmatmul.f32.vlgmr.msra.gmra.mxu2 %v1387_v42  ;;  %1466 = vmatmul.f32.vlgmr.msra.gmra.mxu3 %v1387_v42 }
 0x58b   :  { %v1407_v40 = vpop.f32.mrf.mxu0  ;;  %v1427_v43 = vpop.f32.mrf.mxu1 }
 0x58c   :  { %v1470_v55 = vadd.f32 %v1407_v40, %v3372_v47  ;;  %v1471_v62 = vadd.f32 %v1427_v43, %v3373_v46 }
 0x58e   :  { %v1605_v13 = vmul.f32 -1.442695, %v1470_v55  ;;  %v1606_v25 = vmul.f32 -1.442695, %v1471_v62 }
 0x590   :  { %1727 = vpow2.f32 %v1605_v13 }
 0x591   :  { %1729 = vpow2.f32 %v1606_v25 }
 0x592   :  { %v1467_v57 = vpop.f32.mrf.mxu3  ;;  %v1447_v51 = vpop.f32.mrf.mxu2 }
 0x593   :  { %v1473_v50 = vadd.f32 %v1467_v57, %v3374_v52  ;;  %v1472_v61 = vadd.f32 %v1447_v51, %v3375_v56 }
 0x595   :  { %v1607_v0 = vmul.f32 -1.442695, %v1473_v50 }
 0x596   :  { %v1728_v49 = vpop.eup %1727 }
 0x597   :  { %v1730_v44 = vpop.eup %1729  ;;  %v1477_v45 = vadd.f32 1.0, %v1728_v49  ;;  %1731 = vpow2.f32 %v1607_v0 }
 0x598   :  { %v1496_v63 = vadd.f32 1.0, %v1730_v44 }
 0x599   :  { %1733 = vrcp.f32 %v1477_v45  ;;  %v1489_v9 = vand.u32 2147483648, %v1477_v45  ;;  %v1487_v2 = vand.u32 2147483647, %v1477_v45  ;;  %vm1483_vm6 = vweird.f32 %v1477_v45 }
 0x59a   :  { %1735 = vrcp.f32 %v1496_v63  ;;  %v1508_v12 = vand.u32 2147483648, %v1496_v63  ;;  %v1506_v11 = vand.u32 2147483647, %v1496_v63  ;;  %vm1502_vm7 = vweird.f32 %v1496_v63 }
 0x59b   :  { %v1490_v7 = vor.u32 1.1754944e-38, %v1489_v9  ;;  %vm1488_vm10 = vcmp.eq.f32.partialorder %v1487_v2, 8.507059e+37 }
 0x59c   :  { %v1509_v16 = vor.u32 1.1754944e-38, %v1508_v12  ;;  %vm1507_vm11 = vcmp.eq.f32.partialorder %v1506_v11, 8.507059e+37 }
 0x59d   :  { %v1732_v26 = vpop.eup %1731 }
 0x59e   :  { %v1516_v53 = vadd.f32 1.0, %v1732_v26 }
 0x59f   :  { %v1734_v48 = vpop.eup %1733 }
 0x5a0   :  { %v1736_v54 = vpop.eup %1735  ;;  %v1479_v58 = vmul.f32 %v1734_v48, %v1477_v45  ;;  %1737 = vrcp.f32 %v1516_v53  ;;  %vm1484_vm4 = vweird.f32 %v1734_v48  ;;  %v1528_v8 = vand.u32 2147483648, %v1516_v53 }
 0x5a1   :  { %v1498_v59 = vmul.f32 %v1736_v54, %v1496_v63  ;;  %1739 = vtanh.f32 %v1472_v61  ;;  %vm1503_vm5 = vweird.f32 %v1736_v54  ;;  %vm1485_vm8 = vmor %vm1483_vm6, %vm1484_vm4  ;;  %vm1522_vm13 = vweird.f32 %v1516_v53 }
 0x5a2   :  { %v1480_v60 = vsub.f32 1.0, %v1479_v58  ;;  %vm1504_vm9 = vmor %vm1502_vm7, %vm1503_vm5  ;;  %v1526_v39 = vand.u32 2147483647, %v1516_v53  ;;  %v1529_v30 = vor.u32 1.1754944e-38, %v1528_v8 }
 0x5a3   :  { %v1499_v28 = vsub.f32 1.0, %v1498_v59 }
 0x5a4   :  { %v1481_v1 = vmul.f32 %v1734_v48, %v1480_v60  ;;  %vm1527_vm15 = vcmp.eq.f32.partialorder %v1526_v39, 8.507059e+37 }
 0x5a5   :  { %v1500_v6 = vmul.f32 %v1736_v54, %v1499_v28 }
 0x5a6   :  { %v1738_v4 = vpop.eup %1737  ;;  %v1482_v15 = vadd.f32 %v1734_v48, %v1481_v1 }
 0x5a7   :  { %v1501_v24 = vadd.f32 %v1736_v54, %v1500_v6  ;;  %v1518_v21 = vmul.f32 %v1738_v4, %v1516_v53  ;;  %v1740_v23 = vpop.eup %1739  ;;  %vm1523_vm12 = vweird.f32 %v1738_v4 }
 0x5a8   :  { %v1486_v17 = vsel %vm1485_vm8, %v1734_v48, %v1482_v15  ;;  %vm1524_vm14 = vmor %vm1522_vm13, %vm1523_vm12 }
 0x5a9   :  { %v1491_v5 = vsel %vm1488_vm10, %v1490_v7, %v1486_v17  ;;  %v1505_v20 = vsel %vm1504_vm9, %v1736_v54, %v1501_v24  ;;  %v1519_v22 = vsub.f32 1.0, %v1518_v21 }
 0x5aa   :  { %v1510_v10 = vsel %vm1507_vm11, %v1509_v16, %v1505_v20  ;;  %v1533_v19 = vmul.f32 %v1740_v23, %v1491_v5 }
 0x5ab   :  { %v1532_v14 = vmul.f32 %v1510_v10, %v3054_v32  ;;  %v1520_v18 = vmul.f32 %v1738_v4, %v1519_v22 }
 0x5ad   :  { %v1534_v27 = vadd.f32 %v1533_v19, %v1532_v14  ;;  %v1521_v3 = vadd.f32 %v1738_v4, %v1520_v18 }
 0x5af   :  { %1741 = vtanh.f32 %v1534_v27  ;;  %1540 = vst [vmem:[#allocation6] sm:$0xff] %v1534_v27  ;;  %v1525_v29 = vsel %vm1524_vm14, %v1738_v4, %v1521_v3 }
 0x5b0   :  { %1564 = dma.vmem_to_hbm [thread:$0]  %s1560_s10, 128, %s1562_s13, [#allocation7]   ;;  %v1530_v32 = vsel %vm1527_vm15, %v1529_v30, %v1525_v29 }
 0x5b5   :  { %v1742_v31 = vpop.eup %1741 }
 0x5b6   :  { %v1536_v33 = vmul.f32 %v1742_v31, %v1530_v32 }
 0x5b8   :  { %1608 = vst [vmem:[%s3078_s4 + $0x38] sm:$0xff] %v1536_v33 }
 0x5b9   :  { %1539 = vst [vmem:[#allocation5] sm:$0xff] %v1536_v33 }
 0x5ba   :  { %1553 = dma.vmem_to_hbm [thread:$0]  %s1549_s6, 128, %s1551_s17, [#allocation4]  }
 0x5bb   :  { %1881 = dma.done.wait [#allocation4], 128  }
 0x5bc   :  { %1882 = vsyncadd [#allocation4], 4294967168 }
 0x5bd   :  { %1883 = dma.done.wait [#allocation7], 128  }
 0x5be   :  { %1884 = vsyncadd [#allocation7], 4294967168 }
 0x5bf   :  { %1575 = vsyncpa [#allocation3], 1 }
 0x5c0   :  { %1576 = vsyncpa [#allocation4], 1 }
 0x5c1   :  { %1577 = vsyncpa [#allocation7], 1 }

</bundles_post_ra>
